<compile_context>
chip_gen: v6e
topology: v6e:2x2x1
jax: 0.10.0
libtpu: 0.0.40
codegen_flags: <defaults>
</compile_context>

<pallas_src>
import functools
import math

import jax
import jax.numpy as jnp
from jax.experimental import pallas as pl
from jax.experimental.pallas import tpu as pltpu


def _pe_kernel(inv_freq_ref, phase_ref, pos_off_ref, o_ref, *, pos_per_row):
    """Write the full sinusoidal table as one (rows, width) slab.

    angle[r, c] = (r * pos_per_row + pos_off[c]) * inv_freq[c] + phase[c]
    pe[r, c]    = sin(angle[r, c])     # cos columns folded in via +pi/2 phase
    """
    rows, width = o_ref.shape
    row = jax.lax.broadcasted_iota(jnp.int32, (rows, width), 0).astype(jnp.float32)
    pos = row * jnp.float32(pos_per_row) + pos_off_ref[...]
    angle = pos * inv_freq_ref[...] + phase_ref[...]
    o_ref[...] = jnp.sin(angle)


@functools.lru_cache(maxsize=None)
def _pe_table(head_dim: int, max_len: int) -> jax.Array:
    """Build the (1, max_len, head_dim) sinusoidal table with one Pallas call."""
    # Per-feature constants (compile-time; computed once in the wrapper, not
    # per-element inside the kernel — removes the in-kernel exp entirely).
    dim = jnp.arange(head_dim, dtype=jnp.float32)
    is_odd = dim % 2.0
    two_k = dim - is_odd
    inv_freq_d = jnp.exp(two_k * (-math.log(10000.0) / head_dim))
    phase_d = is_odd * (math.pi / 2.0)  # odd (cos) slots: cos(x) = sin(x + pi/2)

    total = max_len * head_dim
    if total % 128 == 0 and 128 % head_dim == 0:
        # Lane-dense slab: each 128-wide row packs (128 // head_dim) positions.
        pos_per_row = 128 // head_dim
        rows, width = total // 128, 128
        inv_freq = jnp.tile(inv_freq_d, pos_per_row)[None, :]
        phase = jnp.tile(phase_d, pos_per_row)[None, :]
        pos_off = jnp.repeat(
            jnp.arange(pos_per_row, dtype=jnp.float32), head_dim
        )[None, :]
    else:
        # Fallback: (max_len, head_dim) single block (still one grid step).
        pos_per_row = 1
        rows, width = max_len, head_dim
        inv_freq = inv_freq_d[None, :]
        phase = phase_d[None, :]
        pos_off = jnp.zeros((1, width), jnp.float32)

    slab = pl.pallas_call(
        functools.partial(_pe_kernel, pos_per_row=pos_per_row),
        out_shape=jax.ShapeDtypeStruct((rows, width), jnp.float32),
        grid_spec=pltpu.PrefetchScalarGridSpec(
            num_scalar_prefetch=0,
            grid=(1,),
            in_specs=[pl.BlockSpec((1, width), lambda i: (0, 0))] * 3,
            out_specs=pl.BlockSpec((rows, width), lambda i: (0, 0)),
        ),
        compiler_params=pltpu.CompilerParams(
            dimension_semantics=("arbitrary",)
        ),
    )(inv_freq, phase, pos_off)

    # Contiguous row-major reshape back to the logical layout (free plumbing).
    return slab.reshape(1, max_len, head_dim)


def positional_encoding_forward(x: jax.Array, head_dim: int, max_len: int = 512):
    """JAX/Pallas equivalent of PositionalEncoding.forward.

    Args:
        x: (batch, seq_len, d_model) array; only seq_len (static) is used.
    Returns:
        (1, seq_len, head_dim) float32 positional encodings.
    """
    seq_len = x.shape[1]
    if seq_len > max_len:
        raise ValueError(
            f"Sequence length {seq_len} exceeds maximum length {max_len}"
        )
    pe = _pe_table(head_dim, max_len)  # built once, cached (like the torch buffer)
    return pe[:, :seq_len]


def _reference_pe(seq_len: int, head_dim: int, max_len: int = 512):
    """Pure-JAX reference mirroring the PyTorch buffer construction."""
    position = jnp.arange(max_len, dtype=jnp.float32)[:, None]
    div_term = jnp.exp(
        jnp.arange(0, head_dim, 2, dtype=jnp.float32)
        * (-math.log(10000.0) / head_dim)
    )
    pe = jnp.zeros((max_len, head_dim), dtype=jnp.float32)
    pe = pe.at[:, 0::2].set(jnp.sin(position * div_term))
    pe = pe.at[:, 1::2].set(jnp.cos(position * div_term))
    return pe[None, :seq_len, :]


if __name__ == "__main__":
    head_dim = 32
    max_len = 512
    batch, seq_len = 2, 8

    key = jax.random.PRNGKey(0)
    x = jax.random.normal(key, (batch, seq_len, head_dim), dtype=jnp.float32)

    out = positional_encoding_forward(x, head_dim=head_dim, max_len=max_len)
    out = jax.block_until_ready(out)

    ref = _reference_pe(seq_len, head_dim, max_len)
    assert out.shape == (1, seq_len, head_dim), out.shape
    assert out.dtype == jnp.float32
    assert jnp.allclose(out, ref, atol=2e-5, rtol=2e-5), "mismatch vs reference"

    print("KERNEL_OK")
</pallas_src>

<mosaic_0001>
module attributes {stable_mosaic.version = 11 : i64} {
  func.func @_pe_kernel(%arg0: i32, %arg1: memref<1x128xf32, #tpu.memory_space<vmem>>, %arg2: memref<1x128xf32, #tpu.memory_space<vmem>>, %arg3: memref<1x128xf32, #tpu.memory_space<vmem>>, %arg4: memref<128x128xf32, #tpu.memory_space<vmem>>) attributes {dimension_semantics = [#tpu.dimension_semantics<arbitrary>], iteration_bounds = array<i64: 1>, scalar_prefetch = 0 : i64, scratch_operands = 0 : i64, tpu.core_type = #tpu.core_type<tc>, window_params = [{pipeline_mode = #tpu.pipeline_mode<synchronous>, transform_indices = @transform_0, window_bounds = array<i64: 1, 128>}, {pipeline_mode = #tpu.pipeline_mode<synchronous>, transform_indices = @transform_1, window_bounds = array<i64: 1, 128>}, {pipeline_mode = #tpu.pipeline_mode<synchronous>, transform_indices = @transform_2, window_bounds = array<i64: 1, 128>}, {pipeline_mode = #tpu.pipeline_mode<synchronous>, transform_indices = @transform_3, window_bounds = array<i64: 128, 128>}]} {
    %0 = tpu.iota {dimensions = array<i32: 0>} : vector<128x128xi32>
    %1 = arith.sitofp %0 : vector<128x128xi32> to vector<128x128xf32>
    %cst = arith.constant 4.000000e+00 : f32
    %2 = vector.broadcast %cst : f32 to vector<128x128xf32>
    %3 = arith.mulf %1, %2 : vector<128x128xf32>
    %c0 = arith.constant 0 : index
    %c0_0 = arith.constant 0 : index
    %4 = vector.load %arg3[%c0, %c0_0] : memref<1x128xf32, #tpu.memory_space<vmem>>, vector<1x128xf32>
    %5 = vector.broadcast %4 : vector<1x128xf32> to vector<128x128xf32>
    %6 = arith.addf %3, %5 : vector<128x128xf32>
    %c0_1 = arith.constant 0 : index
    %c0_2 = arith.constant 0 : index
    %7 = vector.load %arg1[%c0_1, %c0_2] : memref<1x128xf32, #tpu.memory_space<vmem>>, vector<1x128xf32>
    %8 = vector.broadcast %7 : vector<1x128xf32> to vector<128x128xf32>
    %9 = arith.mulf %6, %8 : vector<128x128xf32>
    %c0_3 = arith.constant 0 : index
    %c0_4 = arith.constant 0 : index
    %10 = vector.load %arg2[%c0_3, %c0_4] : memref<1x128xf32, #tpu.memory_space<vmem>>, vector<1x128xf32>
    %11 = vector.broadcast %10 : vector<1x128xf32> to vector<128x128xf32>
    %12 = arith.addf %9, %11 : vector<128x128xf32>
    %13 = math.sin %12 : vector<128x128xf32>
    %c0_5 = arith.constant 0 : index
    %c0_6 = arith.constant 0 : index
    %14 = vector.load %arg4[%c0_5, %c0_6] : memref<128x128xf32, #tpu.memory_space<vmem>>, vector<128x128xf32>
    tpu.vector_store %arg4[%c0_5, %c0_6], %13 {strides = array<i32>} : memref<128x128xf32, #tpu.memory_space<vmem>>, vector<128x128xf32>,
    return
  }
  func.func @transform_0(%arg0: i32) -> (i32, i32) {
    %c0_i32 = arith.constant 0 : i32
    %c0_i32_0 = arith.constant 0 : i32
    %c0_i32_1 = arith.constant 0 : i32
    return %c0_i32, %c0_i32_0 : i32, i32
  }
  func.func @transform_1(%arg0: i32) -> (i32, i32) {
    %c0_i32 = arith.constant 0 : i32
    %c0_i32_0 = arith.constant 0 : i32
    %c0_i32_1 = arith.constant 0 : i32
    return %c0_i32, %c0_i32_0 : i32, i32
  }
  func.func @transform_2(%arg0: i32) -> (i32, i32) {
    %c0_i32 = arith.constant 0 : i32
    %c0_i32_0 = arith.constant 0 : i32
    %c0_i32_1 = arith.constant 0 : i32
    return %c0_i32, %c0_i32_0 : i32, i32
  }
  func.func @transform_3(%arg0: i32) -> (i32, i32) {
    %c0_i32 = arith.constant 0 : i32
    %c0_i32_0 = arith.constant 0 : i32
    %c0_i32_1 = arith.constant 0 : i32
    return %c0_i32, %c0_i32_0 : i32, i32
  }
}

</mosaic_0001>

<bundles_post_ra>
// kernel: tpu_custom_call.1
= control target key start
LH: loop header
LB: loop body
LE: loop exit
PB: predicated region body
PF: predicated region fallthrough
CT: control target
= control target key end

     0   :  { %8 = vsyncpa [#allocation3], 0  ;;  %s3309_s0 = inlined_call_operand.hbm [shape: f32[1,128], index: 0, kind: input, shape index: {}]   ;;  %s3310_s1 = inlined_call_operand.vmem [shape: f32[1,128], index: 1, kind: input, shape index: {}]   ;;  %s3311_s2 = inlined_call_operand.vmem [shape: f32[1,128], index: 2, kind: input, shape index: {}]   ;;  %s3312_s3 = inlined_call_operand.hbm [shape: f32[128,128], index: 3, kind: output, shape index: {}]  }
   0x1   :  { %9 = vsyncpa [#allocation4], 0  ;;  %s2091_s12 = smov [#allocation2]  }
   0x2   :  { %s16_s13 = sshll.u32 %s2091_s12, 4  ;;  %s17_s13 = int_to_ptr.vmem [resolvable:$true] %s16_s13 }
   0x3   :  { %s2055_s14 = scalar_lea.vmem %s17_s13, 16  ;;  %s2059_s15 = scalar_lea.vmem %s17_s13, 32 }
   0x4   :  { %p2056_p0 = scmp.ne.s32.totalorder %s17_s13, %s2055_s14  ;;  %p2060_p1 = scmp.lt.s32.totalorder %s17_s13, %s17_s13 }
   0x5   :  { %p2061_p2 = scmp.lt.s32.totalorder %s2059_s15, %s2055_s14 }
   0x7   :  { %p2062_p3 = por %p2061_p2, %p2060_p1 }
   0x9   :  { %p2063_p4 = pnand %p2062_p3, %p2056_p0 }
   0xb   :  { %2066 = shalt.err (!%p2063_p4)
}
   0xc   :  { %19 = dma.hbm_to_vmem [thread:$0]  %s3309_s0, 16, %s17_s13, [#allocation3]  }
   0xd   :  { %2087 = dma.done.wait [#allocation3], 16  }
   0xe   :  { %2088 = vsyncadd [#allocation3], 4294967280  ;;  %v27_v0 = vlaneseq  ;;  %v1842_v38 = vld [vmem:[%s3311_s2] ss:$0 sm:$0xff] }
   0xf   :  { %v1843_v55 = vld [vmem:[#allocation2] ss:$0 sm:$0xff] }
  0x10   :  { %v28_v1 = vshrl.u32 %v27_v0, 7 }
  0x12   :  { %v29_v2 = vadd.s32 8, %v28_v1  ;;  %v32_v3 = vadd.s32 32, %v28_v1  ;;  %v33_v4 = vadd.s32 40, %v28_v1  ;;  %v34_v5 = vadd.s32 48, %v28_v1 }
  0x13   :  { %v35_v6 = vadd.s32 56, %v28_v1  ;;  %v36_v7 = vadd.s32 64, %v28_v1  ;;  %v37_v8 = vadd.s32 72, %v28_v1  ;;  %v38_v9 = vadd.s32 80, %v28_v1 }
  0x14   :  { %v39_v10 = vadd.s32 88, %v28_v1  ;;  %v40_v11 = vadd.s32 96, %v28_v1  ;;  %v41_v12 = vadd.s32 104, %v28_v1  ;;  %v42_v13 = vadd.s32 112, %v28_v1 }
  0x15   :  { %v43_v14 = vadd.s32 120, %v28_v1  ;;  %v30_v15 = vadd.s32 16, %v28_v1  ;;  %v44_v16 = vcvt.s32.f32 %v28_v1  ;;  %v45_v17 = vcvt.s32.f32 %v29_v2 }
  0x16   :  { %v48_v18 = vcvt.s32.f32 %v32_v3  ;;  %v49_v19 = vcvt.s32.f32 %v33_v4  ;;  %v50_v20 = vcvt.s32.f32 %v34_v5  ;;  %v51_v21 = vcvt.s32.f32 %v35_v6 }
  0x17   :  { %v52_v22 = vcvt.s32.f32 %v36_v7  ;;  %v53_v23 = vcvt.s32.f32 %v37_v8  ;;  %v54_v24 = vcvt.s32.f32 %v38_v9  ;;  %v55_v25 = vcvt.s32.f32 %v39_v10  ;;  %v1844_v8 = vld [vmem:[%s3310_s1] ss:$0 sm:$0xff]  ;;  %s2098_s1 = smov [#allocation5]  }
  0x18   :  { %v56_v26 = vcvt.s32.f32 %v40_v11  ;;  %v57_v27 = vcvt.s32.f32 %v41_v12  ;;  %v58_v28 = vcvt.s32.f32 %v42_v13  ;;  %v59_v29 = vcvt.s32.f32 %v43_v14  ;;  %s1830_s20 = sshll.u32 %s2098_s1, 4  ;;  %s1831_s20 = int_to_ptr.vmem [resolvable:$true] %s1830_s20 }
  0x19   :  { %v46_v30 = vcvt.s32.f32 %v30_v15  ;;  %v60_v31 = vmul.f32 4.0, %v44_v16  ;;  %v61_v32 = vmul.f32 4.0, %v45_v17  ;;  %v64_v33 = vmul.f32 4.0, %v48_v18  ;;  %s2067_s21 = scalar_lea.vmem %s1831_s20, 2048  ;;  %p2072_p6 = scmp.lt.s32.totalorder %s1831_s20, %s1831_s20 }
  0x1a   :  { %v65_v34 = vmul.f32 4.0, %v49_v19  ;;  %v66_v35 = vmul.f32 4.0, %v50_v20  ;;  %v67_v36 = vmul.f32 4.0, %v51_v21  ;;  %v68_v37 = vmul.f32 4.0, %v52_v22  ;;  %p2068_p5 = scmp.ne.s32.totalorder %s1831_s20, %s2067_s21  ;;  %p2073_p7 = scmp.lt.s32.totalorder %s2067_s21, %s2067_s21 }
  0x1b   :  { %v69_v39 = vmul.f32 4.0, %v53_v23  ;;  %v70_v40 = vmul.f32 4.0, %v54_v24  ;;  %v71_v41 = vmul.f32 4.0, %v55_v25  ;;  %v72_v42 = vmul.f32 4.0, %v56_v26 }
  0x1c   :  { %v31_v43 = vadd.s32 24, %v28_v1  ;;  %v73_v44 = vmul.f32 4.0, %v57_v27  ;;  %v74_v45 = vmul.f32 4.0, %v58_v28  ;;  %v75_v46 = vmul.f32 4.0, %v59_v29  ;;  %p2074_p8 = por %p2073_p7, %p2072_p6 }
  0x1d   :  { %v62_v47 = vmul.f32 4.0, %v46_v30  ;;  %v83_v48 = vadd.f32 %v1842_v38, %v60_v31  ;;  %v84_v49 = vadd.f32 %v1842_v38, %v61_v32  ;;  %v87_v50 = vadd.f32 %v1842_v38, %v64_v33 }
  0x1e   :  { %v88_v51 = vadd.f32 %v1842_v38, %v65_v34  ;;  %v89_v52 = vadd.f32 %v1842_v38, %v66_v35  ;;  %v90_v53 = vadd.f32 %v1842_v38, %v67_v36  ;;  %v91_v54 = vadd.f32 %v1842_v38, %v68_v37  ;;  %p2075_p9 = pnand %p2074_p8, %p2068_p5 }
  0x1f   :  { %v92_v56 = vadd.f32 %v1842_v38, %v69_v39  ;;  %v93_v57 = vadd.f32 %v1842_v38, %v70_v40  ;;  %v94_v58 = vadd.f32 %v1842_v38, %v71_v41  ;;  %v95_v59 = vadd.f32 %v1842_v38, %v72_v42 }
  0x20   :  { %v47_v60 = vcvt.s32.f32 %v31_v43  ;;  %v96_v61 = vadd.f32 %v1842_v38, %v73_v44  ;;  %v97_v62 = vadd.f32 %v1842_v38, %v74_v45  ;;  %v98_v63 = vadd.f32 %v1842_v38, %v75_v46 }
  0x21   :  { %v85_v0 = vadd.f32 %v1842_v38, %v62_v47  ;;  %v106_v1 = vmul.f32 %v1843_v55, %v83_v48  ;;  %v107_v2 = vmul.f32 %v1843_v55, %v84_v49  ;;  %v110_v3 = vmul.f32 %v1843_v55, %v87_v50 }
  0x22   :  { %v111_v4 = vmul.f32 %v1843_v55, %v88_v51  ;;  %v112_v5 = vmul.f32 %v1843_v55, %v89_v52  ;;  %v113_v6 = vmul.f32 %v1843_v55, %v90_v53  ;;  %v114_v7 = vmul.f32 %v1843_v55, %v91_v54 }
  0x23   :  { %v115_v9 = vmul.f32 %v1843_v55, %v92_v56  ;;  %v116_v10 = vmul.f32 %v1843_v55, %v93_v57  ;;  %v117_v11 = vmul.f32 %v1843_v55, %v94_v58  ;;  %v118_v12 = vmul.f32 %v1843_v55, %v95_v59 }
  0x24   :  { %v63_v13 = vmul.f32 4.0, %v47_v60  ;;  %v119_v14 = vmul.f32 %v1843_v55, %v96_v61  ;;  %v120_v15 = vmul.f32 %v1843_v55, %v97_v62  ;;  %v121_v16 = vmul.f32 %v1843_v55, %v98_v63 }
  0x25   :  { %v108_v17 = vmul.f32 %v1843_v55, %v85_v0  ;;  %v2130_v18 = vadd.f32 %v1844_v8, %v106_v1  ;;  %v2132_v19 = vadd.f32 %v1844_v8, %v107_v2  ;;  %v2134_v20 = vadd.f32 %v1844_v8, %v110_v3 }
  0x26   :  { %v2136_v21 = vadd.f32 %v1844_v8, %v111_v4  ;;  %v2138_v22 = vadd.f32 %v1844_v8, %v112_v5  ;;  %v2140_v23 = vadd.f32 %v1844_v8, %v113_v6  ;;  %v2142_v24 = vadd.f32 %v1844_v8, %v114_v7 }
  0x27   :  { %v2144_v25 = vadd.f32 %v1844_v8, %v115_v9  ;;  %v2146_v26 = vadd.f32 %v1844_v8, %v116_v10  ;;  %v2148_v27 = vadd.f32 %v1844_v8, %v117_v11  ;;  %v2150_v28 = vadd.f32 %v1844_v8, %v118_v12 }
  0x28   :  { %v2152_v29 = vadd.f32 %v1844_v8, %v119_v14  ;;  %v2154_v30 = vadd.f32 %v1844_v8, %v120_v15  ;;  %v2156_v31 = vadd.f32 %v1844_v8, %v121_v16  ;;  %v145_v32 = vand.u32 2147483647, %v2130_v18 }
  0x29   :  { %v2159_v33 = vadd.f32 %v1844_v8, %v108_v17  ;;  %v148_v34 = vand.u32 2139095040, %v2130_v18  ;;  %v249_v35 = vand.u32 2147483647, %v2132_v19  ;;  %v86_v36 = vadd.f32 %v1842_v38, %v63_v13 }
  0x2a   :  { %v252_v37 = vand.u32 2139095040, %v2132_v19  ;;  %v152_v40 = vand.u32 8388607, %v145_v32  ;;  %v2092_v63 = vmov 683565275   ;;  %vm147_vm13 = vcmp.lt.s32.totalorder %v2130_v18, 0 }
  0x2b   :  { %v149_v39 = vshrl.u32 %v148_v34, 23  ;;  %v256_v42 = vand.u32 8388607, %v249_v35  ;;  %v356_v44 = vand.u32 2139095040, %v2159_v33  ;;  %v109_v45 = vmul.f32 %v1843_v55, %v86_v36 }
  0x2c   :  { %v253_v41 = vshrl.u32 %v252_v37, 23  ;;  %v153_v49 = vor.u32 8388608, %v152_v40  ;;  %v353_v58 = vand.u32 2147483647, %v2159_v33  ;;  %v2093_v1 = vmov 2475754826  }
  0x2d   :  { %v1845_v43 = vadd.s32 4294967169, %v149_v39  ;;  %v357_v48 = vshrl.u32 %v356_v44, 23  ;;  %v257_v50 = vor.u32 8388608, %v256_v42  ;;  %v2169_v52 = vadd.f32 %v1844_v8, %v109_v45 }
  0x2e   :  { %v1849_v46 = vadd.s32 4294967169, %v253_v41  ;;  %v2172_v59 = vshll.u32 %v153_v49, 8  ;;  %v2094_v3 = vmov 2131351028   ;;  %v2095_v5 = vmov 2102212464  }
  0x2f   :  { %v155_v47 = vadd.s32 1, %v1845_v43  ;;  %v1853_v51 = vadd.s32 4294967169, %v357_v48  ;;  %v2174_v60 = vshll.u32 %v257_v50, 8  ;;  %v2096_v7 = vmov 920167782  }
  0x30   :  { %v259_v38 = vadd.s32 1, %v1849_v46  ;;  %v2097_v15 = vmov 1326507024   ;;  %vm2277_vm14 = vcmp.le.f32.partialorder %v145_v32, 0.7853982 }
  0x31   :  { %vm156_vm0 = vcmp.gt.s32.totalorder %v155_v47, 0  ;;  %v2176_v61 = vadd.s32 1, %v1853_v51 }
  0x32   :  { %v157_v53 = vsel %vm156_vm0, %v155_v47, 0  ;;  %vm260_vm1 = vcmp.gt.s32.totalorder %v259_v38, 0 }
  0x33   :  { %v158_v54 = vshrl.u32 %v157_v53, 5  ;;  %v159_v56 = vand.u32 31, %v157_v53  ;;  %v261_v57 = vsel %vm260_vm1, %v259_v38, 0  ;;  %vm364_vm11 = vcmp.gt.s32.totalorder %v2176_v61, 0 }
  0x34   :  { %v263_v55 = vand.u32 31, %v261_v57  ;;  %v2183_v9 = vshrl.u32 %v261_v57, 5 }
  0x35   :  { %v160_v62 = vsub.s32 32, %v159_v56  ;;  %v162_v0 = vshll.u32 %v2092_v63, %v159_v56  ;;  %v165_v2 = vshll.u32 %v2093_v1, %v159_v56  ;;  %v168_v4 = vshll.u32 %v2094_v3, %v159_v56 }
  0x36   :  { %v171_v6 = vshll.u32 %v2095_v5, %v159_v56  ;;  %v174_v8 = vshll.u32 %v2096_v7, %v159_v56  ;;  %vm177_vm2 = vcmp.lt.s32.totalorder %v158_v54, 1  ;;  %vm178_vm3 = vcmp.lt.s32.totalorder %v158_v54, 2 }
  0x37   :  { %v161_v10 = vshrl.u32 %v2092_v63, %v160_v62  ;;  %v163_v11 = vshrl.u32 %v2093_v1, %v160_v62  ;;  %v166_v12 = vshrl.u32 %v2094_v3, %v160_v62  ;;  %v169_v13 = vshrl.u32 %v2095_v5, %v160_v62 }
  0x38   :  { %v172_v14 = vshrl.u32 %v2096_v7, %v160_v62  ;;  %v175_v16 = vshrl.u32 %v2097_v15, %v160_v62  ;;  %vm180_vm4 = vcmp.lt.s32.totalorder %v158_v54, 4  ;;  %v264_v37 = vsub.s32 32, %v263_v55 }
  0x39   :  { %v164_v17 = vor.u32 %v163_v11, %v162_v0  ;;  %v167_v34 = vor.u32 %v166_v12, %v165_v2  ;;  %v170_v36 = vor.u32 %v169_v13, %v168_v4  ;;  %vm179_vm5 = vcmp.lt.s32.totalorder %v158_v54, 3 }
  0x3a   :  { %v173_v39 = vor.u32 %v172_v14, %v171_v6  ;;  %v176_v40 = vor.u32 %v175_v16, %v174_v8  ;;  %v266_v41 = vshll.u32 %v2092_v63, %v263_v55  ;;  %v269_v49 = vshll.u32 %v2093_v1, %v263_v55 }
  0x3b   :  { %v181_v42 = vsel %vm177_vm2, %v161_v10, %v164_v17  ;;  %v182_v43 = vsel %vm180_vm4, %v170_v36, 2102212464  ;;  %v185_v44 = vsel %vm177_vm2, %v164_v17, %v167_v34  ;;  %v189_v45 = vsel %vm177_vm2, %v167_v34, %v170_v36 }
  0x3c   :  { %v183_v46 = vsel %vm179_vm5, %v167_v34, %v182_v43  ;;  %v186_v47 = vsel %vm180_vm4, %v173_v39, 920167782  ;;  %v190_v48 = vsel %vm180_vm4, %v176_v40, 1326507024  ;;  %v265_v51 = vshrl.u32 %v2092_v63, %v264_v37 }
  0x3d   :  { %v187_v50 = vsel %vm179_vm5, %v170_v36, %v186_v47  ;;  %v191_v38 = vsel %vm179_vm5, %v173_v39, %v190_v48  ;;  %v267_v53 = vshrl.u32 %v2093_v1, %v264_v37  ;;  %v184_v56 = vsel %vm178_vm3, %v181_v42, %v183_v46 }
  0x3e   :  { %v188_v57 = vsel %vm178_vm3, %v185_v44, %v187_v50  ;;  %v192_v62 = vsel %vm178_vm3, %v189_v45, %v191_v38  ;;  %v270_v0 = vshrl.u32 %v2094_v3, %v264_v37  ;;  %v272_v12 = vshll.u32 %v2094_v3, %v263_v55 }
  0x3f   :  { %v2203_v2 = vmul.u32.u64.low %v2172_v59, %v192_v62  ;;  %v2204_v4 = vmul.u32.u64.high %v2172_v59, %v192_v62, %v2203_v2  ;;  %v2207_v6 = vmul.u32.u64.low %v2172_v59, %v188_v57  ;;  %v2208_v8 = vmul.u32.u64.high %v2172_v59, %v188_v57, %v2207_v6 }
  0x40   :  { %v268_v10 = vor.u32 %v267_v53, %v266_v41  ;;  %v271_v11 = vor.u32 %v270_v0, %v269_v49  ;;  %v273_v13 = vshrl.u32 %v2095_v5, %v264_v37  ;;  %v275_v54 = vshll.u32 %v2095_v5, %v263_v55 }
  0x41   :  { %v276_v14 = vshrl.u32 %v2096_v7, %v264_v37  ;;  %v278_v16 = vshll.u32 %v2096_v7, %v263_v55  ;;  %v279_v17 = vshrl.u32 %v2097_v15, %v264_v37  ;;  %v200_v34 = vmul.u32 %v2172_v59, %v184_v56 }
  0x42   :  { %v274_v36 = vor.u32 %v273_v13, %v272_v12  ;;  %vm281_vm6 = vcmp.lt.s32.totalorder %v2183_v9, 1  ;;  %vm282_vm7 = vcmp.lt.s32.totalorder %v2183_v9, 2  ;;  %vm202_vm8 = vc.u32 %v2204_v4, %v2207_v6 }
  0x43   :  { %v203_v39 = vadd.s32 1, %v2208_v8  ;;  %v277_v40 = vor.u32 %v276_v14, %v275_v54  ;;  %vm283_vm9 = vcmp.lt.s32.totalorder %v2183_v9, 3  ;;  %v280_v41 = vor.u32 %v279_v17, %v278_v16 }
  0x44   :  { %vm284_vm10 = vcmp.lt.s32.totalorder %v2183_v9, 4  ;;  %v285_v55 = vsel %vm281_vm6, %v265_v51, %v268_v10  ;;  %v289_v37 = vsel %vm281_vm6, %v268_v10, %v271_v11  ;;  %v293_v44 = vsel %vm281_vm6, %v271_v11, %v274_v36 }
  0x45   :  { %v204_v59 = vsel %vm202_vm8, %v203_v39, %v2208_v8  ;;  %v286_v42 = vsel %vm284_vm10, %v274_v36, 2102212464  ;;  %v290_v43 = vsel %vm284_vm10, %v277_v40, 920167782  ;;  %v294_v48 = vsel %vm284_vm10, %v280_v41, 1326507024 }
  0x46   :  { %v205_v45 = vadd.s32 %v204_v59, %v200_v34  ;;  %v287_v46 = vsel %vm283_vm9, %v271_v11, %v286_v42  ;;  %v291_v47 = vsel %vm283_vm9, %v274_v36, %v290_v43  ;;  %v295_v38 = vsel %vm283_vm9, %v277_v40, %v294_v48 }
  0x47   :  { %v288_v49 = vsel %vm282_vm7, %v285_v55, %v287_v46  ;;  %v292_v50 = vsel %vm282_vm7, %v289_v37, %v291_v47  ;;  %v296_v53 = vsel %vm282_vm7, %v293_v44, %v295_v38  ;;  %v365_v2 = vsel %vm364_vm11, %v2176_v61, 0 }
  0x48   :  { %v206_v51 = vadd.s32 536870912, %v205_v45  ;;  %v2234_v56 = vmul.u32.u64.low %v2174_v60, %v292_v50  ;;  %v2235_v57 = vmul.u32.u64.high %v2174_v60, %v292_v50, %v2234_v56  ;;  %v367_v10 = vand.u32 31, %v365_v2 }
  0x49   :  { %v2239_v62 = vmul.u32.u64.low %v2174_v60, %v296_v53  ;;  %v2240_v0 = vmul.u32.u64.high %v2174_v60, %v296_v53, %v2239_v62  ;;  %v304_v11 = vmul.u32 %v2174_v60, %v288_v49  ;;  %v360_v12 = vand.u32 8388607, %v353_v58 }
  0x4a   :  { %v207_v8 = vshrl.u32 %v206_v51, 30  ;;  %v457_v9 = vand.u32 2147483647, %v2169_v52  ;;  %v460_v13 = vand.u32 2139095040, %v2169_v52  ;;  %v307_v14 = vadd.s32 1, %v2235_v57 }
  0x4b   :  { %vm306_vm12 = vc.u32 %v2240_v0, %v2234_v56  ;;  %v368_v16 = vsub.s32 32, %v367_v10  ;;  %v361_v34 = vor.u32 8388608, %v360_v12  ;;  %v2260_v41 = vshrl.u32 %v365_v2, 5 }
  0x4c   :  { %v208_v54 = vshll.u32 %v207_v8, 30  ;;  %v308_v60 = vsel %vm306_vm12, %v307_v14, %v2235_v57  ;;  %v461_v36 = vshrl.u32 %v460_v13, 23  ;;  %v2257_v39 = vand.u32 8388607, %v457_v9 }
  0x4d   :  { %v309_v17 = vadd.s32 %v308_v60, %v304_v11  ;;  %v370_v55 = vshll.u32 %v2092_v63, %v367_v10  ;;  %v373_v37 = vshll.u32 %v2093_v1, %v367_v10  ;;  %v371_v42 = vshrl.u32 %v2093_v1, %v368_v16 }
  0x4e   :  { %v2252_v61 = vsub.s32 %v205_v45, %v208_v54  ;;  %v374_v43 = vshrl.u32 %v2094_v3, %v368_v16  ;;  %v376_v44 = vshll.u32 %v2094_v3, %v367_v10  ;;  %v377_v46 = vshrl.u32 %v2095_v5, %v368_v16 }
  0x4f   :  { %v310_v59 = vadd.s32 536870912, %v309_v17  ;;  %v379_v47 = vshll.u32 %v2095_v5, %v367_v10  ;;  %v380_v48 = vshrl.u32 %v2096_v7, %v368_v16  ;;  %v231_v49 = vsub.s32 4, %v207_v8 }
  0x50   :  { %v211_v40 = vsub.s32 0, %v2252_v61  ;;  %v382_v38 = vshll.u32 %v2096_v7, %v367_v10  ;;  %v383_v51 = vshrl.u32 %v2097_v15, %v368_v16  ;;  %v201_v57 = vadd.s32 %v2207_v6, %v2204_v4 }
  0x51   :  { %v2271_v50 = vshrl.u32 %v310_v59, 30  ;;  %v2283_v2 = vshll.u32 %v361_v34, 8  ;;  %v1857_v11 = vadd.s32 4294967169, %v461_v36  ;;  %v369_v13 = vshrl.u32 %v2092_v63, %v368_v16 }
  0x52   :  { %v1846_v45 = vmin.u32 %v211_v40, %v2252_v61  ;;  %v372_v10 = vor.u32 %v371_v42, %v370_v55  ;;  %v375_v54 = vor.u32 %v374_v43, %v373_v37  ;;  %v378_v60 = vor.u32 %v377_v46, %v376_v44 }
  0x53   :  { %v312_v12 = vshll.u32 %v2271_v50, 30  ;;  %v381_v40 = vor.u32 %v380_v48, %v379_v47  ;;  %vm385_vm15 = vcmp.lt.s32.totalorder %v2260_v41, 1  ;;  %v232_v32 = vsel %vm147_vm13, %v231_v49, %v207_v8 }
  0x54   :  { %v213_v62 = vclz %v1846_v45  ;;  %v384_v4 = vor.u32 %v383_v51, %v382_v38  ;;  %vm388_vm0 = vcmp.lt.s32.totalorder %v2260_v41, 4  ;;  %vm386_vm2 = vcmp.lt.s32.totalorder %v2260_v41, 2 }
  0x55   :  { %v2290_v59 = vsub.s32 %v309_v17, %v312_v12  ;;  %vm387_vm3 = vcmp.lt.s32.totalorder %v2260_v41, 3  ;;  %v390_v6 = vsel %vm388_vm0, %v378_v60, 2102212464  ;;  %v389_v36 = vsel %vm385_vm15, %v369_v13, %v372_v10 }
  0x56   :  { %v1847_v14 = vadd.s32 4294967294, %v213_v62  ;;  %v393_v8 = vsel %vm385_vm15, %v372_v10, %v375_v54  ;;  %v394_v42 = vsel %vm388_vm0, %v381_v40, 920167782  ;;  %v391_v44 = vsel %vm387_vm3, %v375_v54, %v390_v6 }
  0x57   :  { %v315_v34 = vsub.s32 0, %v2290_v59  ;;  %v395_v45 = vsel %vm387_vm3, %v378_v60, %v394_v42  ;;  %v397_v46 = vsel %vm385_vm15, %v375_v54, %v378_v60  ;;  %v398_v49 = vsel %vm388_vm0, %v384_v4, 1326507024 }
  0x58   :  { %vm1848_vm1 = vcmp.lt.s32.totalorder %v1847_v14, 0  ;;  %v234_v38 = vsel %vm2277_vm14, 0, %v232_v32  ;;  %v465_v62 = vor.u32 8388608, %v2257_v39  ;;  %v467_v12 = vadd.s32 1, %v1857_v11 }
  0x59   :  { %v216_v16 = vsel %vm1848_vm1, 0, %v1847_v14  ;;  %v1850_v43 = vmin.u32 %v315_v34, %v2290_v59  ;;  %v392_v54 = vsel %vm386_vm2, %v389_v36, %v391_v44  ;;  %v238_v34 = vadd.s32 3, %v234_v38 }
  0x5a   :  { %v217_v17 = vsub.s32 32, %v216_v16  ;;  %v218_v55 = vshll.u32 %v2252_v61, %v216_v16  ;;  %v221_v37 = vsub.s32 4294967266, %v216_v16  ;;  %v396_v61 = vsel %vm386_vm2, %v393_v8, %v395_v45 }
  0x5b   :  { %v317_v51 = vclz %v1850_v43  ;;  %v2326_v4 = vmul.u32.u64.low %v2283_v2, %v396_v61  ;;  %v2327_v6 = vmul.u32.u64.high %v2283_v2, %v396_v61, %v2326_v4  ;;  %v305_v36 = vadd.s32 %v2234_v56, %v2240_v0 }
  0x5c   :  { %v219_v47 = vshrl.u32 %v201_v57, %v217_v17  ;;  %v222_v48 = vadd.s32 127, %v221_v37  ;;  %v399_v57 = vsel %vm387_vm3, %v381_v40, %v398_v49  ;;  %vm468_vm5 = vcmp.gt.s32.totalorder %v467_v12, 0 }
  0x5d   :  { %v1851_v14 = vadd.s32 4294967294, %v317_v51  ;;  %v400_v60 = vsel %vm386_vm2, %v397_v46, %v399_v57  ;;  %v408_v8 = vmul.u32 %v2283_v2, %v392_v54  ;;  %v469_v17 = vsel %vm468_vm5, %v467_v12, 0 }
  0x5e   :  { %v220_v13 = vor.u32 %v219_v47, %v218_v55  ;;  %v223_v10 = vshll.u32 %v222_v48, 23  ;;  %v2331_v11 = vmul.u32.u64.low %v2283_v2, %v400_v60  ;;  %v2332_v16 = vmul.u32.u64.high %v2283_v2, %v400_v60, %v2331_v11 }
  0x5f   :  { %vm1852_vm4 = vcmp.lt.s32.totalorder %v1851_v14, 0  ;;  %v411_v43 = vadd.s32 1, %v2327_v6  ;;  %vm251_vm6 = vcmp.lt.s32.totalorder %v2132_v19, 0  ;;  %v2342_v56 = vshll.u32 %v465_v62, 8 }
  0x60   :  { %v224_v32 = vor.u32 4788187, %v223_v10  ;;  %v227_v39 = vcvt.s32.f32 %v220_v13  ;;  %v320_v41 = vsel %vm1852_vm4, 0, %v1851_v14  ;;  %vm410_vm7 = vc.u32 %v2332_v16, %v2326_v4 }
  0x61   :  { %v321_v55 = vsub.s32 32, %v320_v41  ;;  %v322_v37 = vshll.u32 %v2290_v59, %v320_v41  ;;  %v325_v42 = vsub.s32 4294967266, %v320_v41  ;;  %v412_v46 = vsel %vm410_vm7, %v411_v43, %v2327_v6 }
  0x62   :  { %v225_v40 = vand.u32 2147483647, %v224_v32  ;;  %v471_v2 = vand.u32 31, %v469_v17  ;;  %v2345_v48 = vand.u32 3, %v238_v34  ;;  %v335_v59 = vsub.s32 4, %v2271_v50 }
  0x63   :  { %v323_v0 = vshrl.u32 %v305_v36, %v321_v55  ;;  %v326_v45 = vadd.s32 127, %v325_v42  ;;  %v413_v61 = vadd.s32 %v412_v46, %v408_v8  ;;  %vm2350_vm8 = vcmp.le.f32.partialorder %v249_v35, 0.7853982 }
  0x64   :  { %v228_v44 = vmul.f32 %v227_v39, %v225_v40  ;;  %v2354_v62 = vshrl.u32 %v469_v17, 5  ;;  %v472_v12 = vsub.s32 32, %v471_v2  ;;  %v474_v54 = vshll.u32 %v2092_v63, %v471_v2 }
  0x65   :  { %v324_v38 = vor.u32 %v323_v0, %v322_v37  ;;  %v327_v51 = vshll.u32 %v326_v45, 23  ;;  %v414_v10 = vadd.s32 536870912, %v413_v61  ;;  %v477_v57 = vshll.u32 %v2093_v1, %v471_v2 }
  0x66   :  { %v229_v47 = vxor.u32 2147483648, %v228_v44  ;;  %v480_v6 = vshll.u32 %v2094_v3, %v471_v2  ;;  %v475_v39 = vshrl.u32 %v2093_v1, %v472_v12  ;;  %v478_v11 = vshrl.u32 %v2094_v3, %v472_v12 }
  0x67   :  { %v328_v14 = vor.u32 4788187, %v327_v51  ;;  %v331_v60 = vcvt.s32.f32 %v324_v38  ;;  %v415_v32 = vshrl.u32 %v414_v10, 30  ;;  %v481_v36 = vshrl.u32 %v2095_v5, %v472_v12 }
  0x68   :  { %v230_v13 = vsel %vm147_vm13, %v229_v47, %v228_v44  ;;  %v483_v40 = vshll.u32 %v2095_v5, %v471_v2  ;;  %v336_v53 = vsel %vm251_vm6, %v335_v59, %v2271_v50  ;;  %vm355_vm9 = vcmp.lt.s32.totalorder %v2159_v33, 0 }
  0x69   :  { %v233_v35 = vsel %vm2277_vm14, %v2130_v18, %v230_v13  ;;  %v329_v34 = vand.u32 2147483647, %v328_v14  ;;  %v416_v41 = vshll.u32 %v415_v32, 30  ;;  %vm489_vm10 = vcmp.lt.s32.totalorder %v2354_v62, 1 }
  0x6a   :  { %1983 = vcosq.f32 %v233_v35  ;;  %v561_v8 = vand.u32 2147483647, %v2134_v20  ;;  %v473_v55 = vshrl.u32 %v2092_v63, %v472_v12  ;;  %v484_v37 = vshrl.u32 %v2096_v7, %v472_v12 }
  0x6b   :  { %1985 = vsinq.f32 %v233_v35  ;;  %v332_v17 = vmul.f32 %v331_v60, %v329_v34  ;;  %v486_v42 = vshll.u32 %v2096_v7, %v471_v2  ;;  %v2377_v43 = vsub.s32 %v413_v61, %v416_v41 }
  0x6c   :  { %v476_v44 = vor.u32 %v475_v39, %v474_v54  ;;  %v479_v0 = vor.u32 %v478_v11, %v477_v57  ;;  %v487_v50 = vshrl.u32 %v2097_v15, %v472_v12  ;;  %vm244_vm11 = vcmp.eq.s32.totalorder %v2345_v48, 2 }
  0x6d   :  { %v333_v45 = vxor.u32 2147483648, %v332_v17  ;;  %v482_v46 = vor.u32 %v481_v36, %v480_v6  ;;  %v485_v47 = vor.u32 %v484_v37, %v483_v40  ;;  %vm492_vm12 = vcmp.lt.s32.totalorder %v2354_v62, 4 }
  0x6e   :  { %vm241_vm13 = vcmp.eq.s32.totalorder %v2345_v48, 0  ;;  %v338_v59 = vsel %vm2350_vm8, 0, %v336_v53  ;;  %vm2387_vm14 = vcmp.le.f32.partialorder %v353_v58, 0.7853982  ;;  %v419_v61 = vsub.s32 0, %v2377_v43 }
  0x6f   :  { %v439_v38 = vsub.s32 4, %v415_v32  ;;  %vm491_vm15 = vcmp.lt.s32.totalorder %v2354_v62, 3  ;;  %vm240_vm0 = vcmp.lt.s32.totalorder %v2345_v48, 2  ;;  %v334_v51 = vsel %vm251_vm6, %v333_v45, %v332_v17 }
  0x70   :  { %v488_v12 = vor.u32 %v487_v50, %v486_v42  ;;  %v494_v13 = vsel %vm492_vm12, %v482_v46, 2102212464  ;;  %v498_v58 = vsel %vm492_vm12, %v485_v47, 920167782  ;;  %vm237_vm1 = vweird.f32 %v2130_v18 }
  0x71   :  { %v337_v10 = vsel %vm2350_vm8, %v2132_v19, %v334_v51  ;;  %v1854_v54 = vmin.u32 %v419_v61, %v2377_v43  ;;  %vm490_vm2 = vcmp.lt.s32.totalorder %v2354_v62, 2  ;;  %v497_v57 = vsel %vm489_vm10, %v476_v44, %v479_v0 }
  0x72   :  { %1987 = vcosq.f32 %v337_v10  ;;  %v493_v35 = vsel %vm489_vm10, %v473_v55, %v476_v44  ;;  %v499_v14 = vsel %vm491_vm15, %v482_v46, %v498_v58  ;;  %v564_v60 = vand.u32 2139095040, %v2134_v20 }
  0x73   :  { %1989 = vsinq.f32 %v337_v10  ;;  %v421_v6 = vclz %v1854_v54  ;;  %v495_v49 = vsel %vm491_vm15, %v479_v0, %v494_v13  ;;  %v501_v39 = vsel %vm489_vm10, %v479_v0, %v482_v46 }
  0x74   :  { %v342_v11 = vadd.s32 3, %v338_v59  ;;  %v440_v34 = vsel %vm355_vm9, %v439_v38, %v415_v32  ;;  %v500_v36 = vsel %vm490_vm2, %v497_v57, %v499_v14  ;;  %v502_v40 = vsel %vm492_vm12, %v488_v12, 1326507024 }
  0x75   :  { %v1855_v53 = vadd.s32 4294967294, %v421_v6  ;;  %v503_v41 = vsel %vm491_vm15, %v485_v47, %v502_v40  ;;  %v2426_v17 = vmul.u32.u64.low %v2342_v56, %v500_v36  ;;  %v2427_v55 = vmul.u32.u64.high %v2342_v56, %v500_v36, %v2426_v17 }
  0x76   :  { %v409_v42 = vadd.s32 %v2326_v4, %v2332_v16  ;;  %v496_v32 = vsel %vm490_vm2, %v493_v35, %v495_v49  ;;  %v504_v44 = vsel %vm490_vm2, %v501_v39, %v503_v41  ;;  %v565_v0 = vshrl.u32 %v564_v60, 23 }
  0x77   :  { %v1984_v37 = vpop.eup %1983  ;;  %vm1856_vm3 = vcmp.lt.s32.totalorder %v1855_v53, 0  ;;  %v2437_v46 = vmul.u32.u64.low %v2342_v56, %v504_v44  ;;  %v2438_v47 = vmul.u32.u64.high %v2342_v56, %v504_v44, %v2437_v46  ;;  %v442_v38 = vsel %vm2387_vm14, 0, %v440_v34 }
  0x78   :  { %v1986_v50 = vpop.eup %1985  ;;  %v245_v45 = vxor.u32 2147483648, %v1984_v37  ;;  %v424_v61 = vsel %vm1856_vm3, 0, %v1855_v53  ;;  %v1861_v4 = vadd.s32 4294967169, %v565_v0  ;;  %v512_v58 = vmul.u32 %v2342_v56, %v496_v32 }
  0x79   :  { %v242_v59 = vxor.u32 2147483648, %v1986_v50  ;;  %v425_v51 = vsub.s32 32, %v424_v61  ;;  %v426_v62 = vshll.u32 %v2377_v43, %v424_v61  ;;  %v429_v12 = vsub.s32 4294967266, %v424_v61 }
  0x7a   :  { %v246_v16 = vsel %vm244_vm11, %v245_v45, %v1986_v50  ;;  %v515_v10 = vadd.s32 1, %v2427_v55  ;;  %v571_v54 = vadd.s32 1, %v1861_v4  ;;  %v343_v35 = vand.u32 3, %v342_v11 }
  0x7b   :  { %v243_v13 = vsel %vm241_vm13, %v1984_v37, %v242_v59  ;;  %v427_v14 = vshrl.u32 %v409_v42, %v425_v51  ;;  %v430_v60 = vadd.s32 127, %v429_v12  ;;  %v446_v49 = vadd.s32 3, %v442_v38 }
  0x7c   :  { %v247_v57 = vsel %vm240_vm0, %v243_v13, %v246_v16  ;;  %vm514_vm4 = vc.u32 %v2438_v47, %v2426_v17  ;;  %vm572_vm5 = vcmp.gt.s32.totalorder %v571_v54, 0  ;;  %vm341_vm6 = vweird.f32 %v2132_v19 }
  0x7d   :  { %v248_v6 = vsel %vm237_vm1, nan, %v247_v57  ;;  %v428_v43 = vor.u32 %v427_v14, %v426_v62  ;;  %v431_v39 = vshll.u32 %v430_v60, 23  ;;  %v516_v56 = vsel %vm514_vm4, %v515_v10, %v2427_v55 }
  0x7e   :  { %v573_v34 = vsel %vm572_vm5, %v571_v54, 0  ;;  %1809 = vst [vmem:[#allocation5] sm:$0xff] %v248_v6  ;;  %v517_v48 = vadd.s32 %v516_v56, %v512_v58  ;;  %vm344_vm7 = vcmp.lt.s32.totalorder %v343_v35, 2  ;;  %vm348_vm8 = vcmp.eq.s32.totalorder %v343_v35, 2 }
  0x7f   :  { %v575_v11 = vand.u32 31, %v573_v34  ;;  %v1988_v36 = vpop.eup %1987  ;;  %v432_v18 = vor.u32 4788187, %v431_v39  ;;  %v435_v40 = vcvt.s32.f32 %v428_v43  ;;  %vm345_vm10 = vcmp.eq.s32.totalorder %v343_v35, 0 }
  0x80   :  { %v1990_v53 = vpop.eup %1989  ;;  %v349_v41 = vxor.u32 2147483648, %v1988_v36  ;;  %v518_v37 = vadd.s32 536870912, %v517_v48  ;;  %v2457_v0 = vand.u32 3, %v446_v49  ;;  %v568_v55 = vand.u32 8388607, %v561_v8 }
  0x81   :  { %v576_v42 = vsub.s32 32, %v575_v11  ;;  %v346_v32 = vxor.u32 2147483648, %v1990_v53  ;;  %v433_v44 = vand.u32 2147483647, %v432_v18  ;;  %v578_v46 = vshll.u32 %v2092_v63, %v575_v11 }
  0x82   :  { %v350_v50 = vsel %vm348_vm8, %v349_v41, %v1990_v53  ;;  %v2461_v45 = vshrl.u32 %v518_v37, 30  ;;  %v581_v59 = vshll.u32 %v2093_v1, %v575_v11  ;;  %v584_v16 = vshll.u32 %v2094_v3, %v575_v11 }
  0x83   :  { %v347_v61 = vsel %vm345_vm10, %v1988_v36, %v346_v32  ;;  %v436_v38 = vmul.f32 %v435_v40, %v433_v44  ;;  %v579_v4 = vshrl.u32 %v2093_v1, %v576_v42  ;;  %v582_v12 = vshrl.u32 %v2094_v3, %v576_v42 }
  0x84   :  { %v351_v51 = vsel %vm344_vm7, %v347_v61, %v350_v50  ;;  %v520_v62 = vshll.u32 %v2461_v45, 30  ;;  %v585_v13 = vshrl.u32 %v2095_v5, %v576_v42  ;;  %v569_v54 = vor.u32 8388608, %v568_v55 }
  0x85   :  { %v352_v58 = vsel %vm341_vm6, nan, %v351_v51  ;;  %v437_v10 = vxor.u32 2147483648, %v436_v38  ;;  %v574_v57 = vshrl.u32 %v573_v34, 5  ;;  %v577_v60 = vshrl.u32 %v2092_v63, %v576_v42 }
  0x86   :  { %v2473_v14 = vsub.s32 %v517_v48, %v520_v62  ;;  %v587_v6 = vshll.u32 %v2095_v5, %v575_v11  ;;  %v588_v35 = vshrl.u32 %v2096_v7, %v576_v42  ;;  %1810 = vst [vmem:[#allocation5 + $0x8] sm:$0xff] %v352_v58  ;;  %v580_v43 = vor.u32 %v579_v4, %v578_v46 }
  0x87   :  { %v438_v49 = vsel %vm355_vm9, %v437_v10, %v436_v38  ;;  %v590_v39 = vshll.u32 %v2096_v7, %v575_v11  ;;  %v591_v19 = vshrl.u32 %v2097_v15, %v576_v42  ;;  %v583_v48 = vor.u32 %v582_v12, %v581_v59 }
  0x88   :  { %v441_v56 = vsel %vm2387_vm14, %v2159_v33, %v438_v49  ;;  %v523_v34 = vsub.s32 0, %v2473_v14  ;;  %v586_v36 = vor.u32 %v585_v13, %v584_v16  ;;  %v589_v18 = vor.u32 %v588_v35, %v587_v6 }
  0x89   :  { %1991 = vcosq.f32 %v441_v56  ;;  %v592_v40 = vor.u32 %v591_v19, %v590_v39  ;;  %vm593_vm11 = vcmp.lt.s32.totalorder %v574_v57, 1  ;;  %v609_v41 = vshll.u32 %v569_v54, 8 }
  0x8a   :  { %1993 = vsinq.f32 %v441_v56  ;;  %v1858_v53 = vmin.u32 %v523_v34, %v2473_v14  ;;  %v665_v11 = vand.u32 2147483647, %v2136_v21  ;;  %v513_v37 = vadd.s32 %v2426_v17, %v2438_v47 }
  0x8b   :  { %vm595_vm9 = vcmp.lt.s32.totalorder %v574_v57, 3  ;;  %vm596_vm12 = vcmp.lt.s32.totalorder %v574_v57, 4  ;;  %v668_v2 = vand.u32 2139095040, %v2136_v21  ;;  %vm594_vm13 = vcmp.lt.s32.totalorder %v574_v57, 2 }
  0x8c   :  { %v525_v42 = vclz %v1858_v53  ;;  %v601_v32 = vsel %vm593_vm11, %v580_v43, %v583_v48  ;;  %v605_v44 = vsel %vm593_vm11, %v583_v48, %v586_v36  ;;  %v597_v55 = vsel %vm593_vm11, %v577_v60, %v580_v43 }
  0x8d   :  { %v598_v50 = vsel %vm596_vm12, %v586_v36, 2102212464  ;;  %v602_v46 = vsel %vm596_vm12, %v589_v18, 920167782  ;;  %v606_v59 = vsel %vm596_vm12, %v592_v40, 1326507024  ;;  %vm445_vm15 = vweird.f32 %v2159_v33 }
  0x8e   :  { %v1859_v61 = vadd.s32 4294967294, %v525_v42  ;;  %v599_v38 = vsel %vm595_vm9, %v583_v48, %v598_v50  ;;  %v603_v4 = vsel %vm595_vm9, %v586_v36, %v602_v46  ;;  %v607_v16 = vsel %vm595_vm9, %v589_v18, %v606_v59 }
  0x8f   :  { %v543_v51 = vsub.s32 4, %v2461_v45  ;;  %v604_v17 = vsel %vm594_vm13, %v601_v32, %v603_v4  ;;  %v608_v47 = vsel %vm594_vm13, %v605_v44, %v607_v16  ;;  %v669_v62 = vshrl.u32 %v668_v2, 23 }
  0x90   :  { %vm1860_vm14 = vcmp.lt.s32.totalorder %v1859_v61, 0  ;;  %v600_v12 = vsel %vm594_vm13, %v597_v55, %v599_v38  ;;  %v2495_v13 = vmul.u32.u64.low %v609_v41, %v608_v47  ;;  %v2496_v58 = vmul.u32.u64.high %v609_v41, %v608_v47, %v2495_v13 }
  0x91   :  { %v528_v10 = vsel %vm1860_vm14, 0, %v1859_v61  ;;  %v2499_v54 = vmul.u32.u64.low %v609_v41, %v604_v17  ;;  %v2500_v60 = vmul.u32.u64.high %v609_v41, %v604_v17, %v2499_v54  ;;  %v1865_v6 = vadd.s32 4294967169, %v669_v62 }
  0x92   :  { %vm459_vm0 = vcmp.lt.s32.totalorder %v2169_v52, 0  ;;  %v529_v35 = vsub.s32 32, %v528_v10  ;;  %v530_v49 = vshll.u32 %v2473_v14, %v528_v10  ;;  %v533_v43 = vsub.s32 4294967266, %v528_v10 }
  0x93   :  { %vm448_vm1 = vcmp.lt.s32.totalorder %v2457_v0, 2  ;;  %vm2508_vm2 = vcmp.le.f32.partialorder %v457_v9, 0.7853982  ;;  %v2515_v39 = vsel %vm459_vm0, %v543_v51, %v2461_v45  ;;  %v675_v19 = vadd.s32 1, %v1865_v6 }
  0x94   :  { %v531_v56 = vshrl.u32 %v513_v37, %v529_v35  ;;  %v534_v34 = vadd.s32 127, %v533_v43  ;;  %v616_v48 = vmul.u32 %v609_v41, %v600_v12  ;;  %vm618_vm3 = vc.u32 %v2496_v58, %v2499_v54 }
  0x95   :  { %vm449_vm4 = vcmp.eq.s32.totalorder %v2457_v0, 0  ;;  %v619_v14 = vadd.s32 1, %v2500_v60  ;;  %v672_v9 = vand.u32 8388607, %v665_v11  ;;  %vm676_vm5 = vcmp.gt.s32.totalorder %v675_v19, 0 }
  0x96   :  { %v1992_v36 = vpop.eup %1991  ;;  %vm452_vm6 = vcmp.eq.s32.totalorder %v2457_v0, 2  ;;  %v532_v45 = vor.u32 %v531_v56, %v530_v49  ;;  %v535_v18 = vshll.u32 %v534_v34, 23  ;;  %v677_v40 = vsel %vm676_vm5, %v675_v19, 0 }
  0x97   :  { %v1994_v53 = vpop.eup %1993  ;;  %v453_v37 = vxor.u32 2147483648, %v1992_v36  ;;  %v546_v41 = vsel %vm2508_vm2, 0, %v2515_v39  ;;  %v620_v2 = vsel %vm618_vm3, %v619_v14, %v2500_v60  ;;  %v679_v42 = vand.u32 31, %v677_v40 }
  0x98   :  { %v450_v32 = vxor.u32 2147483648, %v1994_v53  ;;  %v536_v44 = vor.u32 4788187, %v535_v18  ;;  %v539_v55 = vcvt.s32.f32 %v532_v45  ;;  %v621_v50 = vadd.s32 %v620_v2, %v616_v48 }
  0x99   :  { %v454_v46 = vsel %vm452_vm6, %v453_v37, %v1994_v53  ;;  %v673_v59 = vor.u32 8388608, %v672_v9  ;;  %v680_v61 = vsub.s32 32, %v679_v42  ;;  %v772_v38 = vand.u32 2139095040, %v2138_v22 }
  0x9a   :  { %v451_v4 = vsel %vm449_vm4, %v1992_v36, %v450_v32  ;;  %v537_v16 = vand.u32 2147483647, %v536_v44  ;;  %v622_v51 = vadd.s32 536870912, %v621_v50  ;;  %v678_v17 = vshrl.u32 %v677_v40, 5 }
  0x9b   :  { %v455_v47 = vsel %vm448_vm1, %v451_v4, %v454_v46  ;;  %v682_v62 = vshll.u32 %v2092_v63, %v679_v42  ;;  %v683_v12 = vshrl.u32 %v2093_v1, %v680_v61  ;;  %v685_v13 = vshll.u32 %v2093_v1, %v679_v42 }
  0x9c   :  { %v456_v10 = vsel %vm445_vm15, nan, %v455_v47  ;;  %v540_v60 = vmul.f32 %v539_v55, %v537_v16  ;;  %v2538_v6 = vshrl.u32 %v622_v51, 30  ;;  %v686_v35 = vshrl.u32 %v2094_v3, %v680_v61 }
  0x9d   :  { %v688_v49 = vshll.u32 %v2094_v3, %v679_v42  ;;  %v689_v43 = vshrl.u32 %v2095_v5, %v680_v61  ;;  %v691_v0 = vshll.u32 %v2095_v5, %v679_v42  ;;  %v692_v39 = vshrl.u32 %v2096_v7, %v680_v61  ;;  %1811 = vst [vmem:[#allocation5 + $0x10] sm:$0xff] %v456_v10 }
  0x9e   :  { %v541_v19 = vxor.u32 2147483648, %v540_v60  ;;  %v624_v56 = vshll.u32 %v2538_v6, 30  ;;  %v2546_v34 = vshll.u32 %v673_v59, 8  ;;  %v773_v33 = vshrl.u32 %v772_v38, 23 }
  0x9f   :  { %v681_v48 = vshrl.u32 %v2092_v63, %v680_v61  ;;  %v684_v14 = vor.u32 %v683_v12, %v682_v62  ;;  %v694_v9 = vshll.u32 %v2096_v7, %v679_v42  ;;  %v695_v36 = vshrl.u32 %v2097_v15, %v680_v61 }
  0xa0   :  { %v542_v45 = vsel %vm459_vm0, %v541_v19, %v540_v60  ;;  %v2553_v18 = vsub.s32 %v621_v50, %v624_v56  ;;  %v687_v40 = vor.u32 %v686_v35, %v685_v13  ;;  %v693_v53 = vor.u32 %v692_v39, %v691_v0 }
  0xa1   :  { %v545_v37 = vsel %vm2508_vm2, %v2169_v52, %v542_v45  ;;  %v690_v2 = vor.u32 %v689_v43, %v688_v49  ;;  %v696_v32 = vor.u32 %v695_v36, %v694_v9  ;;  %vm697_vm7 = vcmp.lt.s32.totalorder %v678_v17, 1 }
  0xa2   :  { %1995 = vcosq.f32 %v545_v37  ;;  %v627_v44 = vsub.s32 0, %v2553_v18  ;;  %vm699_vm8 = vcmp.lt.s32.totalorder %v678_v17, 3  ;;  %vm700_vm10 = vcmp.lt.s32.totalorder %v678_v17, 4 }
  0xa3   :  { %1997 = vsinq.f32 %v545_v37  ;;  %vm698_vm11 = vcmp.lt.s32.totalorder %v678_v17, 2  ;;  %v701_v42 = vsel %vm697_vm7, %v681_v48, %v684_v14  ;;  %v702_v55 = vsel %vm700_vm10, %v690_v2, 2102212464 }
  0xa4   :  { %v1862_v50 = vmin.u32 %v627_v44, %v2553_v18  ;;  %v703_v46 = vsel %vm699_vm8, %v687_v40, %v702_v55  ;;  %v705_v59 = vsel %vm697_vm7, %v684_v14, %v687_v40  ;;  %v706_v61 = vsel %vm700_vm10, %v693_v53, 920167782 }
  0xa5   :  { %v707_v57 = vsel %vm699_vm8, %v690_v2, %v706_v61  ;;  %v709_v38 = vsel %vm697_vm7, %v687_v40, %v690_v2  ;;  %v710_v4 = vsel %vm700_vm10, %v696_v32, 1326507024  ;;  %v550_v16 = vadd.s32 3, %v546_v41 }
  0xa6   :  { %v629_v51 = vclz %v1862_v50  ;;  %v704_v47 = vsel %vm698_vm11, %v701_v42, %v703_v46  ;;  %v708_v62 = vsel %vm698_vm11, %v705_v59, %v707_v57  ;;  %v711_v12 = vsel %vm699_vm8, %v693_v53, %v710_v4 }
  0xa7   :  { %v1869_v13 = vadd.s32 4294967169, %v773_v33  ;;  %v712_v60 = vsel %vm698_vm11, %v709_v38, %v711_v12  ;;  %v2567_v35 = vmul.u32.u64.low %v2546_v34, %v708_v62  ;;  %v2568_v49 = vmul.u32.u64.high %v2546_v34, %v708_v62, %v2567_v35 }
  0xa8   :  { %v1863_v10 = vadd.s32 4294967294, %v629_v51  ;;  %v647_v43 = vsub.s32 4, %v2538_v6  ;;  %v2573_v41 = vmul.u32.u64.low %v2546_v34, %v712_v60  ;;  %v2574_v0 = vmul.u32.u64.high %v2546_v34, %v712_v60, %v2573_v41 }
  0xa9   :  { %v779_v39 = vadd.s32 1, %v1869_v13  ;;  %vm549_vm9 = vweird.f32 %v2169_v52  ;;  %vm563_vm12 = vcmp.lt.s32.totalorder %v2134_v20, 0  ;;  %v617_v17 = vadd.s32 %v2499_v54, %v2496_v58 }
  0xaa   :  { %vm1864_vm13 = vcmp.lt.s32.totalorder %v1863_v10, 0  ;;  %v769_v19 = vand.u32 2147483647, %v2138_v22  ;;  %v551_v56 = vand.u32 3, %v550_v16  ;;  %v720_v48 = vmul.u32 %v2546_v34, %v704_v47 }
  0xab   :  { %v632_v33 = vsel %vm1864_vm13, 0, %v1863_v10  ;;  %vm780_vm14 = vcmp.gt.s32.totalorder %v779_v39, 0  ;;  %v723_v45 = vadd.s32 1, %v2568_v49  ;;  %vm2586_vm15 = vcmp.le.f32.partialorder %v561_v8, 0.7853982 }
  0xac   :  { %v633_v14 = vsub.s32 32, %v632_v33  ;;  %v634_v9 = vshll.u32 %v2553_v18, %v632_v33  ;;  %v637_v36 = vsub.s32 4294967266, %v632_v33  ;;  %v2593_v58 = vsel %vm563_vm12, %v647_v43, %v2538_v6 }
  0xad   :  { %vm722_vm0 = vc.u32 %v2574_v0, %v2567_v35  ;;  %v781_v54 = vsel %vm780_vm14, %v779_v39, 0  ;;  %v776_v37 = vand.u32 8388607, %v769_v19  ;;  %vm552_vm1 = vcmp.lt.s32.totalorder %v551_v56, 2 }
  0xae   :  { %v635_v34 = vshrl.u32 %v617_v17, %v633_v14  ;;  %v638_v18 = vadd.s32 127, %v637_v36  ;;  %v724_v53 = vsel %vm722_vm0, %v723_v45, %v2568_v49  ;;  %vm556_vm2 = vcmp.eq.s32.totalorder %v551_v56, 2 }
  0xaf   :  { %v1996_v8 = vpop.eup %1995  ;;  %v725_v2 = vadd.s32 %v724_v53, %v720_v48  ;;  %v783_v32 = vand.u32 31, %v781_v54  ;;  %vm553_vm3 = vcmp.eq.s32.totalorder %v551_v56, 0  ;;  %v650_v46 = vsel %vm2586_vm15, 0, %v2593_v58 }
  0xb0   :  { %v1998_v44 = vpop.eup %1997  ;;  %v557_v6 = vxor.u32 2147483648, %v1996_v8  ;;  %v636_v42 = vor.u32 %v635_v34, %v634_v9  ;;  %v639_v55 = vshll.u32 %v638_v18, 23  ;;  %v777_v16 = vor.u32 8388608, %v776_v37 }
  0xb1   :  { %v554_v50 = vxor.u32 2147483648, %v1998_v44  ;;  %v726_v59 = vadd.s32 536870912, %v725_v2  ;;  %v784_v61 = vsub.s32 32, %v783_v32  ;;  %v786_v62 = vshll.u32 %v2092_v63, %v783_v32 }
  0xb2   :  { %v558_v57 = vsel %vm556_vm2, %v557_v6, %v1998_v44  ;;  %v640_v38 = vor.u32 4788187, %v639_v55  ;;  %v643_v4 = vcvt.s32.f32 %v636_v42  ;;  %v789_v12 = vshll.u32 %v2093_v1, %v783_v32 }
  0xb3   :  { %v555_v51 = vsel %vm553_vm3, %v1996_v8, %v554_v50  ;;  %v2603_v47 = vshrl.u32 %v726_v59, 30  ;;  %v787_v60 = vshrl.u32 %v2093_v1, %v784_v61  ;;  %v790_v49 = vshrl.u32 %v2094_v3, %v784_v61 }
  0xb4   :  { %v559_v13 = vsel %vm552_vm1, %v555_v51, %v558_v57  ;;  %v641_v10 = vand.u32 2147483647, %v640_v38  ;;  %v782_v39 = vshrl.u32 %v781_v54, 5  ;;  %v876_v17 = vand.u32 2139095040, %v2140_v23 }
  0xb5   :  { %v560_v43 = vsel %vm549_vm9, nan, %v559_v13  ;;  %v728_v41 = vshll.u32 %v2603_v47, 30  ;;  %v792_v48 = vshll.u32 %v2094_v3, %v783_v32  ;;  %v793_v14 = vshrl.u32 %v2095_v5, %v784_v61 }
  0xb6   :  { %v644_v33 = vmul.f32 %v643_v4, %v641_v10  ;;  %v795_v56 = vshll.u32 %v2095_v5, %v783_v32  ;;  %1812 = vst [vmem:[#allocation5 + $0x18] sm:$0xff] %v560_v43  ;;  %v796_v36 = vshrl.u32 %v2096_v7, %v784_v61  ;;  %v798_v52 = vshll.u32 %v2096_v7, %v783_v32 }
  0xb7   :  { %v2617_v9 = vsub.s32 %v725_v2, %v728_v41  ;;  %v2621_v45 = vshll.u32 %v777_v16, 8  ;;  %v788_v54 = vor.u32 %v787_v60, %v786_v62  ;;  %v791_v34 = vor.u32 %v790_v49, %v789_v12 }
  0xb8   :  { %v645_v58 = vxor.u32 2147483648, %v644_v33  ;;  %v799_v18 = vshrl.u32 %v2097_v15, %v784_v61  ;;  %v785_v37 = vshrl.u32 %v2092_v63, %v784_v61  ;;  %v797_v8 = vor.u32 %v796_v36, %v795_v56 }
  0xb9   :  { %v731_v53 = vsub.s32 0, %v2617_v9  ;;  %vm801_vm4 = vcmp.lt.s32.totalorder %v782_v39, 1  ;;  %vm667_vm5 = vcmp.lt.s32.totalorder %v2136_v21, 0  ;;  %v794_v44 = vor.u32 %v793_v14, %v792_v48 }
  0xba   :  { %v646_v2 = vsel %vm563_vm12, %v645_v58, %v644_v33  ;;  %vm802_vm6 = vcmp.lt.s32.totalorder %v782_v39, 2  ;;  %vm804_vm7 = vcmp.lt.s32.totalorder %v782_v39, 4  ;;  %v800_v42 = vor.u32 %v799_v18, %v798_v52 }
  0xbb   :  { %v649_v32 = vsel %vm2586_vm15, %v2134_v20, %v646_v2  ;;  %v1866_v6 = vmin.u32 %v731_v53, %v2617_v9  ;;  %vm803_vm8 = vcmp.lt.s32.totalorder %v782_v39, 3  ;;  %v806_v55 = vsel %vm804_vm7, %v794_v44, 2102212464 }
  0xbc   :  { %1999 = vcosq.f32 %v649_v32  ;;  %v809_v50 = vsel %vm801_vm4, %v788_v54, %v791_v34  ;;  %v810_v59 = vsel %vm804_vm7, %v797_v8, 920167782  ;;  %v654_v61 = vadd.s32 3, %v650_v46 }
  0xbd   :  { %2001 = vsinq.f32 %v649_v32  ;;  %v733_v57 = vclz %v1866_v6  ;;  %v877_v38 = vshrl.u32 %v876_v17, 23  ;;  %v805_v4 = vsel %vm801_vm4, %v785_v37, %v788_v54 }
  0xbe   :  { %v807_v40 = vsel %vm803_vm8, %v791_v34, %v806_v55  ;;  %v811_v16 = vsel %vm803_vm8, %v794_v44, %v810_v59  ;;  %v813_v51 = vsel %vm801_vm4, %v791_v34, %v794_v44  ;;  %v751_v12 = vsub.s32 4, %v2603_v47 }
  0xbf   :  { %v1867_v62 = vadd.s32 4294967294, %v733_v57  ;;  %v812_v13 = vsel %vm802_vm6, %v809_v50, %v811_v16  ;;  %v814_v10 = vsel %vm804_vm7, %v800_v42, 1326507024  ;;  %v721_v46 = vadd.s32 %v2567_v35, %v2574_v0 }
  0xc0   :  { %v815_v60 = vsel %vm803_vm8, %v797_v8, %v814_v10  ;;  %v2647_v49 = vmul.u32.u64.low %v2621_v45, %v812_v13  ;;  %v2648_v43 = vmul.u32.u64.high %v2621_v45, %v812_v13, %v2647_v49  ;;  %v808_v41 = vsel %vm802_vm6, %v805_v4, %v807_v40 }
  0xc1   :  { %vm1868_vm10 = vcmp.lt.s32.totalorder %v1867_v62, 0  ;;  %v816_v17 = vsel %vm802_vm6, %v813_v51, %v815_v60  ;;  %v1873_v33 = vadd.s32 4294967169, %v877_v38  ;;  %v873_v35 = vand.u32 2147483647, %v2140_v23 }
  0xc2   :  { %v736_v48 = vsel %vm1868_vm10, 0, %v1867_v62  ;;  %v2654_v14 = vmul.u32.u64.low %v2621_v45, %v816_v17  ;;  %v2655_v56 = vmul.u32.u64.high %v2621_v45, %v816_v17, %v2654_v14  ;;  %v752_v58 = vsel %vm667_vm5, %v751_v12, %v2603_v47 }
  0xc3   :  { %v737_v0 = vsub.s32 32, %v736_v48  ;;  %v738_v36 = vshll.u32 %v2617_v9, %v736_v48  ;;  %v741_v52 = vsub.s32 4294967266, %v736_v48  ;;  %v655_v54 = vand.u32 3, %v654_v61 }
  0xc4   :  { %v824_v39 = vmul.u32 %v2621_v45, %v808_v41  ;;  %v827_v34 = vadd.s32 1, %v2648_v43  ;;  %v883_v18 = vadd.s32 1, %v1873_v33  ;;  %vm2666_vm11 = vcmp.le.f32.partialorder %v665_v11, 0.7853982 }
  0xc5   :  { %v739_v37 = vshrl.u32 %v721_v46, %v737_v0  ;;  %v742_v8 = vadd.s32 127, %v741_v52  ;;  %v754_v9 = vsel %vm2666_vm11, 0, %v752_v58  ;;  %vm826_vm9 = vc.u32 %v2655_v56, %v2647_v49 }
  0xc6   :  { %v880_v47 = vand.u32 8388607, %v873_v35  ;;  %vm884_vm12 = vcmp.gt.s32.totalorder %v883_v18, 0  ;;  %v828_v44 = vsel %vm826_vm9, %v827_v34, %v2648_v43  ;;  %vm653_vm13 = vweird.f32 %v2134_v20 }
  0xc7   :  { %v740_v45 = vor.u32 %v739_v37, %v738_v36  ;;  %v743_v2 = vshll.u32 %v742_v8, 23  ;;  %v885_v11 = vsel %vm884_vm12, %v883_v18, 0  ;;  %vm656_vm14 = vcmp.lt.s32.totalorder %v655_v54, 2 }
  0xc8   :  { %v829_v32 = vadd.s32 %v828_v44, %v824_v39  ;;  %v887_v6 = vand.u32 31, %v885_v11  ;;  %vm657_vm15 = vcmp.eq.s32.totalorder %v655_v54, 0  ;;  %vm660_vm0 = vcmp.eq.s32.totalorder %v655_v54, 2 }
  0xc9   :  { %v2000_v42 = vpop.eup %1999  ;;  %v744_v55 = vor.u32 4788187, %v743_v2  ;;  %v747_v50 = vcvt.s32.f32 %v740_v45  ;;  %v758_v57 = vadd.s32 3, %v754_v9  ;;  %v881_v51 = vor.u32 8388608, %v880_v47 }
  0xca   :  { %v2002_v59 = vpop.eup %2001  ;;  %v661_v61 = vxor.u32 2147483648, %v2000_v42  ;;  %v830_v38 = vadd.s32 536870912, %v829_v32  ;;  %v888_v4 = vsub.s32 32, %v887_v6  ;;  %v977_v62 = vand.u32 2147483647, %v2142_v24 }
  0xcb   :  { %v658_v40 = vxor.u32 2147483648, %v2002_v59  ;;  %v745_v16 = vand.u32 2147483647, %v744_v55  ;;  %v890_v10 = vshll.u32 %v2092_v63, %v887_v6  ;;  %v893_v46 = vshll.u32 %v2093_v1, %v887_v6 }
  0xcc   :  { %v662_v12 = vsel %vm660_vm0, %v661_v61, %v2002_v59  ;;  %v2679_v13 = vshrl.u32 %v830_v38, 30  ;;  %v891_v41 = vshrl.u32 %v2093_v1, %v888_v4  ;;  %v896_v17 = vshll.u32 %v2094_v3, %v887_v6 }
  0xcd   :  { %v659_v60 = vsel %vm657_vm15, %v2000_v42, %v658_v40  ;;  %v748_v43 = vmul.f32 %v747_v50, %v745_v16  ;;  %v894_v14 = vshrl.u32 %v2094_v3, %v888_v4  ;;  %v897_v0 = vshrl.u32 %v2095_v5, %v888_v4 }
  0xce   :  { %v663_v33 = vsel %vm656_vm14, %v659_v60, %v662_v12  ;;  %v832_v48 = vshll.u32 %v2679_v13, 30  ;;  %v886_v58 = vshrl.u32 %v885_v11, 5  ;;  %v980_v39 = vand.u32 2139095040, %v2142_v24 }
  0xcf   :  { %v664_v36 = vsel %vm653_vm13, nan, %v663_v33  ;;  %v749_v52 = vxor.u32 2147483648, %v748_v43  ;;  %v889_v18 = vshrl.u32 %v2092_v63, %v888_v4  ;;  %v899_v54 = vshll.u32 %v2095_v5, %v887_v6 }
  0xd0   :  { %v2693_v34 = vsub.s32 %v829_v32, %v832_v48  ;;  %v900_v37 = vshrl.u32 %v2096_v7, %v888_v4  ;;  %1813 = vst [vmem:[#allocation5 + $0x20] sm:$0xff] %v664_v36  ;;  %v892_v9 = vor.u32 %v891_v41, %v890_v10  ;;  %v902_v20 = vshll.u32 %v2096_v7, %v887_v6 }
  0xd1   :  { %v750_v8 = vsel %vm667_vm5, %v749_v52, %v748_v43  ;;  %v903_v47 = vshrl.u32 %v2097_v15, %v888_v4  ;;  %v895_v44 = vor.u32 %v894_v14, %v893_v46  ;;  %v898_v11 = vor.u32 %v897_v0, %v896_v17 }
  0xd2   :  { %v753_v45 = vsel %vm2666_vm11, %v2136_v21, %v750_v8  ;;  %v835_v2 = vsub.s32 0, %v2693_v34  ;;  %v901_v32 = vor.u32 %v900_v37, %v899_v54  ;;  %vm905_vm1 = vcmp.lt.s32.totalorder %v886_v58, 1 }
  0xd3   :  { %2003 = vcosq.f32 %v753_v45  ;;  %v904_v42 = vor.u32 %v903_v47, %v902_v20  ;;  %v2706_v55 = vand.u32 3, %v758_v57  ;;  %vm771_vm2 = vcmp.lt.s32.totalorder %v2138_v22, 0 }
  0xd4   :  { %2005 = vsinq.f32 %v753_v45  ;;  %v1870_v6 = vmin.u32 %v835_v2, %v2693_v34  ;;  %v921_v50 = vshll.u32 %v881_v51, 8  ;;  %vm907_vm3 = vcmp.lt.s32.totalorder %v886_v58, 3 }
  0xd5   :  { %vm908_vm4 = vcmp.lt.s32.totalorder %v886_v58, 4  ;;  %v981_v53 = vshrl.u32 %v980_v39, 23  ;;  %v984_v59 = vand.u32 8388607, %v977_v62  ;;  %vm906_vm5 = vcmp.lt.s32.totalorder %v886_v58, 2 }
  0xd6   :  { %v837_v61 = vclz %v1870_v6  ;;  %v913_v38 = vsel %vm905_vm1, %v892_v9, %v895_v44  ;;  %v917_v4 = vsel %vm905_vm1, %v895_v44, %v898_v11  ;;  %v909_v40 = vsel %vm905_vm1, %v889_v18, %v892_v9 }
  0xd7   :  { %v910_v16 = vsel %vm908_vm4, %v898_v11, 2102212464  ;;  %v914_v12 = vsel %vm908_vm4, %v901_v32, 920167782  ;;  %v918_v57 = vsel %vm908_vm4, %v904_v42, 1326507024  ;;  %v825_v48 = vadd.s32 %v2647_v49, %v2655_v56 }
  0xd8   :  { %v1871_v10 = vadd.s32 4294967294, %v837_v61  ;;  %v911_v46 = vsel %vm907_vm3, %v895_v44, %v910_v16  ;;  %v915_v60 = vsel %vm907_vm3, %v898_v11, %v914_v12  ;;  %v919_v43 = vsel %vm907_vm3, %v901_v32, %v918_v57 }
  0xd9   :  { %v855_v51 = vsub.s32 4, %v2679_v13  ;;  %v916_v41 = vsel %vm906_vm5, %v913_v38, %v915_v60  ;;  %v920_v17 = vsel %vm906_vm5, %v917_v4, %v919_v43  ;;  %v1877_v33 = vadd.s32 4294967169, %v981_v53 }
  0xda   :  { %vm1872_vm6 = vcmp.lt.s32.totalorder %v1871_v10, 0  ;;  %v2717_v14 = vmul.u32.u64.low %v921_v50, %v920_v17  ;;  %v2718_v0 = vmul.u32.u64.high %v921_v50, %v920_v17, %v2717_v14  ;;  %vm757_vm7 = vweird.f32 %v2136_v21 }
  0xdb   :  { %v840_v36 = vsel %vm1872_vm6, 0, %v1871_v10  ;;  %v912_v52 = vsel %vm906_vm5, %v909_v40, %v911_v46  ;;  %v2722_v39 = vmul.u32.u64.low %v921_v50, %v916_v41  ;;  %v2723_v18 = vmul.u32.u64.high %v921_v50, %v916_v41, %v2722_v39 }
  0xdc   :  { %v841_v54 = vsub.s32 32, %v840_v36  ;;  %v842_v37 = vshll.u32 %v2693_v34, %v840_v36  ;;  %v845_v8 = vsub.s32 4294967266, %v840_v36  ;;  %v987_v9 = vadd.s32 1, %v1877_v33 }
  0xdd   :  { %vm760_vm8 = vcmp.lt.s32.totalorder %v2706_v55, 2  ;;  %vm2730_vm10 = vcmp.le.f32.partialorder %v769_v19, 0.7853982  ;;  %v2737_v56 = vsel %vm771_vm2, %v855_v51, %v2679_v13  ;;  %v985_v58 = vor.u32 8388608, %v984_v59 }
  0xde   :  { %v843_v20 = vshrl.u32 %v825_v48, %v841_v54  ;;  %v846_v47 = vadd.s32 127, %v845_v8  ;;  %v928_v45 = vmul.u32 %v921_v50, %v912_v52  ;;  %vm930_vm11 = vc.u32 %v2718_v0, %v2722_v39 }
  0xdf   :  { %vm761_vm9 = vcmp.eq.s32.totalorder %v2706_v55, 0  ;;  %vm764_vm12 = vcmp.eq.s32.totalorder %v2706_v55, 2  ;;  %v931_v19 = vadd.s32 1, %v2723_v18  ;;  %vm988_vm13 = vcmp.gt.s32.totalorder %v987_v9, 0 }
  0xe0   :  { %v2004_v34 = vpop.eup %2003  ;;  %v844_v2 = vor.u32 %v843_v20, %v842_v37  ;;  %v847_v44 = vshll.u32 %v846_v47, 23  ;;  %v858_v13 = vsel %vm2730_vm10, 0, %v2737_v56  ;;  %v989_v11 = vsel %vm988_vm13, %v987_v9, 0 }
  0xe1   :  { %v2006_v32 = vpop.eup %2005  ;;  %v765_v42 = vxor.u32 2147483648, %v2004_v34  ;;  %v932_v6 = vsel %vm930_vm11, %v931_v19, %v2723_v18  ;;  %v991_v50 = vand.u32 31, %v989_v11  ;;  %v2748_v53 = vshll.u32 %v985_v58, 8 }
  0xe2   :  { %v762_v59 = vxor.u32 2147483648, %v2006_v32  ;;  %v848_v61 = vor.u32 4788187, %v847_v44  ;;  %v851_v38 = vcvt.s32.f32 %v844_v2  ;;  %vm875_vm14 = vcmp.lt.s32.totalorder %v2140_v23, 0 }
  0xe3   :  { %v933_v4 = vadd.s32 %v932_v6, %v928_v45  ;;  %v766_v40 = vsel %vm764_vm12, %v765_v42, %v2006_v32  ;;  %v992_v16 = vsub.s32 32, %v991_v50  ;;  %v994_v12 = vshll.u32 %v2092_v63, %v991_v50 }
  0xe4   :  { %v1084_v57 = vand.u32 2139095040, %v2144_v25  ;;  %v763_v10 = vsel %vm761_vm9, %v2004_v34, %v762_v59  ;;  %v849_v46 = vand.u32 2147483647, %v848_v61  ;;  %v997_v43 = vshll.u32 %v2093_v1, %v991_v50 }
  0xe5   :  { %v934_v60 = vadd.s32 536870912, %v933_v4  ;;  %v767_v51 = vsel %vm760_vm8, %v763_v10, %v766_v40  ;;  %v995_v41 = vshrl.u32 %v2093_v1, %v992_v16  ;;  %v998_v17 = vshrl.u32 %v2094_v3, %v992_v16 }
  0xe6   :  { %v1000_v33 = vshll.u32 %v2094_v3, %v991_v50  ;;  %v768_v48 = vsel %vm757_vm7, nan, %v767_v51  ;;  %v852_v14 = vmul.f32 %v851_v38, %v849_v46  ;;  %v1001_v52 = vshrl.u32 %v2095_v5, %v992_v16 }
  0xe7   :  { %v935_v36 = vshrl.u32 %v934_v60, 30  ;;  %v990_v18 = vshrl.u32 %v989_v11, 5  ;;  %v1003_v54 = vshll.u32 %v2095_v5, %v991_v50  ;;  %v1004_v37 = vshrl.u32 %v2096_v7, %v992_v16  ;;  %1814 = vst [vmem:[#allocation5 + $0x28] sm:$0xff] %v768_v48 }
  0xe8   :  { %v1085_v55 = vshrl.u32 %v1084_v57, 23  ;;  %v853_v8 = vxor.u32 2147483648, %v852_v14  ;;  %v993_v20 = vshrl.u32 %v2092_v63, %v992_v16  ;;  %v996_v47 = vor.u32 %v995_v41, %v994_v12 }
  0xe9   :  { %v936_v9 = vshll.u32 %v935_v36, 30  ;;  %v959_v58 = vsub.s32 4, %v935_v36  ;;  %v999_v45 = vor.u32 %v998_v17, %v997_v43  ;;  %v1006_v21 = vshll.u32 %v2096_v7, %v991_v50 }
  0xea   :  { %v1007_v19 = vshrl.u32 %v2097_v15, %v992_v16  ;;  %v854_v34 = vsel %vm771_vm2, %v853_v8, %v852_v14  ;;  %v1002_v44 = vor.u32 %v1001_v52, %v1000_v33  ;;  %v1005_v11 = vor.u32 %v1004_v37, %v1003_v54 }
  0xeb   :  { %v2773_v2 = vsub.s32 %v933_v4, %v936_v9  ;;  %v857_v32 = vsel %vm2730_vm10, %v2138_v22, %v854_v34  ;;  %v960_v42 = vsel %vm875_vm14, %v959_v58, %v935_v36  ;;  %vm1009_vm15 = vcmp.lt.s32.totalorder %v990_v18, 1 }
  0xec   :  { %v1008_v6 = vor.u32 %v1007_v19, %v1006_v21  ;;  %2007 = vcosq.f32 %v857_v32  ;;  %vm1011_vm0 = vcmp.lt.s32.totalorder %v990_v18, 3  ;;  %vm1012_vm1 = vcmp.lt.s32.totalorder %v990_v18, 4 }
  0xed   :  { %v939_v50 = vsub.s32 0, %v2773_v2  ;;  %2009 = vsinq.f32 %v857_v32  ;;  %vm1010_vm2 = vcmp.lt.s32.totalorder %v990_v18, 2  ;;  %v1013_v59 = vsel %vm1009_vm15, %v993_v20, %v996_v47 }
  0xee   :  { %v1014_v61 = vsel %vm1012_vm1, %v1002_v44, 2102212464  ;;  %v1017_v40 = vsel %vm1009_vm15, %v996_v47, %v999_v45  ;;  %v1018_v16 = vsel %vm1012_vm1, %v1005_v11, 920167782  ;;  %vm2785_vm3 = vcmp.le.f32.partialorder %v873_v35, 0.7853982 }
  0xef   :  { %v1874_v38 = vmin.u32 %v939_v50, %v2773_v2  ;;  %v1015_v4 = vsel %vm1011_vm0, %v999_v45, %v1014_v61  ;;  %v1019_v57 = vsel %vm1011_vm0, %v1002_v44, %v1018_v16  ;;  %v1021_v10 = vsel %vm1009_vm15, %v999_v45, %v1002_v44 }
  0xf0   :  { %v1022_v46 = vsel %vm1012_vm1, %v1008_v6, 1326507024  ;;  %v862_v60 = vadd.s32 3, %v858_v13  ;;  %v962_v51 = vsel %vm2785_vm3, 0, %v960_v42  ;;  %v1016_v41 = vsel %vm1010_vm2, %v1013_v59, %v1015_v4 }
  0xf1   :  { %v941_v43 = vclz %v1874_v38  ;;  %v1020_v35 = vsel %vm1010_vm2, %v1017_v40, %v1019_v57  ;;  %v1023_v17 = vsel %vm1011_vm0, %v1005_v11, %v1022_v46  ;;  %v1881_v33 = vadd.s32 4294967169, %v1085_v55 }
  0xf2   :  { %v1024_v14 = vsel %vm1010_vm2, %v1021_v10, %v1023_v17  ;;  %v2801_v36 = vmul.u32.u64.low %v2748_v53, %v1020_v35  ;;  %v2802_v49 = vmul.u32.u64.high %v2748_v53, %v1020_v35, %v2801_v36  ;;  %v1081_v52 = vand.u32 2147483647, %v2144_v25 }
  0xf3   :  { %v1875_v48 = vadd.s32 4294967294, %v941_v43  ;;  %v2806_v56 = vmul.u32.u64.low %v2748_v53, %v1024_v14  ;;  %v2807_v13 = vmul.u32.u64.high %v2748_v53, %v1024_v14, %v2806_v56  ;;  %v1091_v54 = vadd.s32 1, %v1881_v33 }
  0xf4   :  { %v863_v37 = vand.u32 3, %v862_v60  ;;  %v929_v8 = vadd.s32 %v2722_v39, %v2718_v0  ;;  %v966_v18 = vadd.s32 3, %v962_v51  ;;  %v1032_v9 = vmul.u32 %v2748_v53, %v1016_v41 }
  0xf5   :  { %vm1876_vm4 = vcmp.lt.s32.totalorder %v1875_v48, 0  ;;  %vm1092_vm5 = vcmp.gt.s32.totalorder %v1091_v54, 0  ;;  %v1035_v45 = vadd.s32 1, %v2802_v49  ;;  %vm861_vm6 = vweird.f32 %v2138_v22 }
  0xf6   :  { %v944_v55 = vsel %vm1876_vm4, 0, %v1875_v48  ;;  %vm1034_vm7 = vc.u32 %v2807_v13, %v2801_v36  ;;  %v1088_v0 = vand.u32 8388607, %v1081_v52  ;;  %v1093_v39 = vsel %vm1092_vm5, %v1091_v54, 0 }
  0xf7   :  { %v945_v58 = vsub.s32 32, %v944_v55  ;;  %v946_v20 = vshll.u32 %v2773_v2, %v944_v55  ;;  %v949_v47 = vsub.s32 4294967266, %v944_v55  ;;  %vm864_vm8 = vcmp.lt.s32.totalorder %v863_v37, 2 }
  0xf8   :  { %v1036_v53 = vsel %vm1034_vm7, %v1035_v45, %v2802_v49  ;;  %vm865_vm10 = vcmp.eq.s32.totalorder %v863_v37, 0  ;;  %vm868_vm11 = vcmp.eq.s32.totalorder %v863_v37, 2  ;;  %v1095_v44 = vand.u32 31, %v1093_v39 }
  0xf9   :  { %v947_v21 = vshrl.u32 %v929_v8, %v945_v58  ;;  %v950_v19 = vadd.s32 127, %v949_v47  ;;  %v2008_v34 = vpop.eup %2007  ;;  %v1037_v2 = vadd.s32 %v1036_v53, %v1032_v9  ;;  %v2821_v50 = vand.u32 3, %v966_v18 }
  0xfa   :  { %v2010_v11 = vpop.eup %2009  ;;  %v869_v32 = vxor.u32 2147483648, %v2008_v34  ;;  %v1089_v38 = vor.u32 8388608, %v1088_v0  ;;  %v1096_v4 = vsub.s32 32, %v1095_v44  ;;  %v1185_v10 = vand.u32 2147483647, %v2146_v26 }
  0xfb   :  { %v948_v42 = vor.u32 %v947_v21, %v946_v20  ;;  %v951_v6 = vshll.u32 %v950_v19, 23  ;;  %v866_v59 = vxor.u32 2147483648, %v2010_v11  ;;  %v1038_v61 = vadd.s32 536870912, %v1037_v2 }
  0xfc   :  { %v870_v40 = vsel %vm868_vm11, %v869_v32, %v2010_v11  ;;  %v1098_v43 = vshll.u32 %v2092_v63, %v1095_v44  ;;  %v1101_v51 = vshll.u32 %v2093_v1, %v1095_v44  ;;  %v1099_v17 = vshrl.u32 %v2093_v1, %v1096_v4 }
  0xfd   :  { %v952_v16 = vor.u32 4788187, %v951_v6  ;;  %v955_v57 = vcvt.s32.f32 %v948_v42  ;;  %v867_v46 = vsel %vm865_vm10, %v2008_v34, %v866_v59  ;;  %v1039_v60 = vshrl.u32 %v1038_v61, 30 }
  0xfe   :  { %v871_v41 = vsel %vm864_vm8, %v867_v46, %v870_v40  ;;  %v1102_v33 = vshrl.u32 %v2094_v3, %v1096_v4  ;;  %v1094_v49 = vshrl.u32 %v1093_v39, 5  ;;  %v1188_v56 = vand.u32 2139095040, %v2146_v26 }
  0xff   :  { %v953_v35 = vand.u32 2147483647, %v952_v16  ;;  %v872_v48 = vsel %vm861_vm6, nan, %v871_v41  ;;  %v1040_v14 = vshll.u32 %v1039_v60, 30  ;;  %v1104_v8 = vshll.u32 %v2094_v3, %v1095_v44 }
 0x100   :  { %v1105_v55 = vshrl.u32 %v2095_v5, %v1096_v4  ;;  %v1107_v37 = vshll.u32 %v2095_v5, %v1095_v44  ;;  %1815 = vst [vmem:[#allocation5 + $0x30] sm:$0xff] %v872_v48  ;;  %v1108_v9 = vshrl.u32 %v2096_v7, %v1096_v4  ;;  %v1110_v58 = vshll.u32 %v2096_v7, %v1095_v44 }
 0x101   :  { %v956_v54 = vmul.f32 %v955_v57, %v953_v35  ;;  %v2836_v18 = vsub.s32 %v1037_v2, %v1040_v14  ;;  %v2840_v22 = vshll.u32 %v1089_v38, 8  ;;  %v1100_v47 = vor.u32 %v1099_v17, %v1098_v43 }
 0x102   :  { %v1103_v45 = vor.u32 %v1102_v33, %v1101_v51  ;;  %v1111_v0 = vshrl.u32 %v2097_v15, %v1096_v4  ;;  %vm979_vm9 = vcmp.lt.s32.totalorder %v2142_v24, 0  ;;  %v1097_v21 = vshrl.u32 %v2092_v63, %v1096_v4 }
 0x103   :  { %v957_v20 = vxor.u32 2147483648, %v956_v54  ;;  %v1043_v39 = vsub.s32 0, %v2836_v18  ;;  %v1109_v19 = vor.u32 %v1108_v9, %v1107_v37  ;;  %vm1113_vm12 = vcmp.lt.s32.totalorder %v1094_v49, 1 }
 0x104   :  { %v1106_v34 = vor.u32 %v1105_v55, %v1104_v8  ;;  %vm1114_vm13 = vcmp.lt.s32.totalorder %v1094_v49, 2  ;;  %vm1116_vm15 = vcmp.lt.s32.totalorder %v1094_v49, 4  ;;  %v1112_v11 = vor.u32 %v1111_v0, %v1110_v58 }
 0x105   :  { %v958_v53 = vsel %vm875_vm14, %v957_v20, %v956_v54  ;;  %v1878_v44 = vmin.u32 %v1043_v39, %v2836_v18  ;;  %vm1115_vm0 = vcmp.lt.s32.totalorder %v1094_v49, 3  ;;  %v1121_v42 = vsel %vm1113_vm12, %v1100_v47, %v1103_v45 }
 0x106   :  { %v961_v2 = vsel %vm2785_vm3, %v2140_v23, %v958_v53  ;;  %v1118_v32 = vsel %vm1116_vm15, %v1106_v34, 2102212464  ;;  %v1122_v6 = vsel %vm1116_vm15, %v1109_v19, 920167782  ;;  %v1063_v61 = vsub.s32 4, %v1039_v60 }
 0x107   :  { %2011 = vcosq.f32 %v961_v2  ;;  %v1045_v59 = vclz %v1878_v44  ;;  %v1189_v38 = vshrl.u32 %v1188_v56, 23  ;;  %v1117_v4 = vsel %vm1113_vm12, %v1097_v21, %v1100_v47 }
 0x108   :  { %2013 = vsinq.f32 %v961_v2  ;;  %v1119_v12 = vsel %vm1115_vm0, %v1103_v45, %v1118_v32  ;;  %v1123_v40 = vsel %vm1115_vm0, %v1106_v34, %v1122_v6  ;;  %v1125_v16 = vsel %vm1113_vm12, %v1103_v45, %v1106_v34 }
 0x109   :  { %v1033_v57 = vadd.s32 %v2801_v36, %v2807_v13  ;;  %v1879_v46 = vadd.s32 4294967294, %v1045_v59  ;;  %v1124_v43 = vsel %vm1114_vm13, %v1121_v42, %v1123_v40  ;;  %v1126_v51 = vsel %vm1116_vm15, %v1112_v11, 1326507024 }
 0x10a   :  { %v1127_v41 = vsel %vm1115_vm0, %v1109_v19, %v1126_v51  ;;  %v2865_v35 = vmul.u32.u64.low %v2840_v22, %v1124_v43  ;;  %v2866_v17 = vmul.u32.u64.high %v2840_v22, %v1124_v43, %v2865_v35  ;;  %v1192_v33 = vand.u32 8388607, %v1185_v10 }
 0x10b   :  { %vm1880_vm14 = vcmp.lt.s32.totalorder %v1879_v46, 0  ;;  %v1120_v48 = vsel %vm1114_vm13, %v1117_v4, %v1119_v12  ;;  %v1128_v36 = vsel %vm1114_vm13, %v1125_v16, %v1127_v41  ;;  %v1885_v13 = vadd.s32 4294967169, %v1189_v38 }
 0x10c   :  { %v1048_v14 = vsel %vm1880_vm14, 0, %v1879_v46  ;;  %v1064_v56 = vsel %vm979_vm9, %v1063_v61, %v1039_v60  ;;  %v2876_v54 = vmul.u32.u64.low %v2840_v22, %v1128_v36  ;;  %v2877_v8 = vmul.u32.u64.high %v2840_v22, %v1128_v36, %v2876_v54 }
 0x10d   :  { %v1049_v55 = vsub.s32 32, %v1048_v14  ;;  %v1050_v37 = vshll.u32 %v2836_v18, %v1048_v14  ;;  %v1053_v9 = vsub.s32 4294967266, %v1048_v14  ;;  %v1195_v58 = vadd.s32 1, %v1885_v13 }
 0x10e   :  { %vm965_vm1 = vweird.f32 %v2140_v23  ;;  %v1136_v20 = vmul.u32 %v2840_v22, %v1120_v48  ;;  %v1139_v49 = vadd.s32 1, %v2866_v17  ;;  %vm2885_vm2 = vcmp.le.f32.partialorder %v977_v62, 0.7853982 }
 0x10f   :  { %v1051_v60 = vshrl.u32 %v1033_v57, %v1049_v55  ;;  %v1054_v45 = vadd.s32 127, %v1053_v9  ;;  %vm1196_vm3 = vcmp.gt.s32.totalorder %v1195_v58, 0  ;;  %v1066_v18 = vsel %vm2885_vm2, 0, %v1064_v56 }
 0x110   :  { %vm1138_vm4 = vc.u32 %v2877_v8, %v2865_v35  ;;  %v1193_v0 = vor.u32 8388608, %v1192_v33  ;;  %v1197_v39 = vsel %vm1196_vm3, %v1195_v58, 0  ;;  %vm968_vm5 = vcmp.lt.s32.totalorder %v2821_v50, 2 }
 0x111   :  { %v1052_v22 = vor.u32 %v1051_v60, %v1050_v37  ;;  %v1055_v21 = vshll.u32 %v1054_v45, 23  ;;  %v1140_v62 = vsel %vm1138_vm4, %v1139_v49, %v2866_v17  ;;  %vm969_vm6 = vcmp.eq.s32.totalorder %v2821_v50, 0 }
 0x112   :  { %vm972_vm7 = vcmp.eq.s32.totalorder %v2821_v50, 2  ;;  %v1141_v19 = vadd.s32 %v1140_v62, %v1136_v20  ;;  %v1199_v53 = vand.u32 31, %v1197_v39  ;;  %v2897_v11 = vadd.s32 3, %v1066_v18 }
 0x113   :  { %v1056_v2 = vor.u32 4788187, %v1055_v21  ;;  %v1059_v44 = vcvt.s32.f32 %v1052_v22  ;;  %v1289_v32 = vand.u32 2147483647, %v2148_v27  ;;  %v2900_v38 = vshll.u32 %v1193_v0, 8 }
 0x114   :  { %v2012_v34 = vpop.eup %2011  ;;  %v1142_v59 = vadd.s32 536870912, %v1141_v19  ;;  %v1200_v61 = vsub.s32 32, %v1199_v53  ;;  %v1198_v40 = vshrl.u32 %v1197_v39, 5  ;;  %v1292_v16 = vand.u32 2139095040, %v2148_v27 }
 0x115   :  { %v2014_v42 = vpop.eup %2013  ;;  %v973_v6 = vxor.u32 2147483648, %v2012_v34  ;;  %v1057_v12 = vand.u32 2147483647, %v1056_v2  ;;  %v1202_v43 = vshll.u32 %v2092_v63, %v1199_v53  ;;  %v1205_v33 = vshll.u32 %v2093_v1, %v1199_v53 }
 0x116   :  { %v970_v4 = vxor.u32 2147483648, %v2014_v42  ;;  %v2905_v46 = vshrl.u32 %v1142_v59, 30  ;;  %v1203_v51 = vshrl.u32 %v2093_v1, %v1200_v61  ;;  %v1206_v48 = vshrl.u32 %v2094_v3, %v1200_v61 }
 0x117   :  { %v974_v57 = vsel %vm972_vm7, %v973_v6, %v2014_v42  ;;  %v1060_v17 = vmul.f32 %v1059_v44, %v1057_v12  ;;  %v1208_v14 = vshll.u32 %v2094_v3, %v1199_v53  ;;  %v1209_v56 = vshrl.u32 %v2095_v5, %v1200_v61 }
 0x118   :  { %v971_v41 = vsel %vm969_vm6, %v2012_v34, %v970_v4  ;;  %v1144_v13 = vshll.u32 %v2905_v46, 30  ;;  %v1201_v37 = vshrl.u32 %v2092_v63, %v1200_v61  ;;  %vm1217_vm8 = vcmp.lt.s32.totalorder %v1198_v40, 1 }
 0x119   :  { %v975_v36 = vsel %vm968_vm5, %v971_v41, %v974_v57  ;;  %v1061_v55 = vxor.u32 2147483648, %v1060_v17  ;;  %v1204_v58 = vor.u32 %v1203_v51, %v1202_v43  ;;  %v1211_v20 = vshll.u32 %v2095_v5, %v1199_v53 }
 0x11a   :  { %v976_v54 = vsel %vm965_vm1, nan, %v975_v36  ;;  %v2921_v9 = vsub.s32 %v1141_v19, %v1144_v13  ;;  %v1212_v50 = vshrl.u32 %v2096_v7, %v1200_v61  ;;  %v1207_v60 = vor.u32 %v1206_v48, %v1205_v33 }
 0x11b   :  { %1816 = vst [vmem:[#allocation5 + $0x38] sm:$0xff] %v976_v54  ;;  %v1062_v49 = vsel %vm979_vm9, %v1061_v55, %v1060_v17  ;;  %v1214_v45 = vshll.u32 %v2096_v7, %v1199_v53  ;;  %v1215_v23 = vshrl.u32 %v2097_v15, %v1200_v61  ;;  %v1210_v39 = vor.u32 %v1209_v56, %v1208_v14 }
 0x11c   :  { %v1065_v18 = vsel %vm2885_vm2, %v2142_v24, %v1062_v49  ;;  %v1147_v0 = vsub.s32 0, %v2921_v9  ;;  %v1213_v22 = vor.u32 %v1212_v50, %v1211_v20  ;;  %vm1220_vm10 = vcmp.lt.s32.totalorder %v1198_v40, 4 }
 0x11d   :  { %2015 = vcosq.f32 %v1065_v18  ;;  %v1216_v21 = vor.u32 %v1215_v23, %v1214_v45  ;;  %v1293_v62 = vshrl.u32 %v1292_v16, 23  ;;  %vm1218_vm11 = vcmp.lt.s32.totalorder %v1198_v40, 2 }
 0x11e   :  { %2017 = vsinq.f32 %v1065_v18  ;;  %v1882_v19 = vmin.u32 %v1147_v0, %v2921_v9  ;;  %vm1219_vm9 = vcmp.lt.s32.totalorder %v1198_v40, 3  ;;  %v1221_v53 = vsel %vm1217_vm8, %v1201_v37, %v1204_v58 }
 0x11f   :  { %v1222_v34 = vsel %vm1220_vm10, %v1210_v39, 2102212464  ;;  %v1225_v47 = vsel %vm1217_vm8, %v1204_v58, %v1207_v60  ;;  %v1226_v2 = vsel %vm1220_vm10, %v1213_v22, 920167782  ;;  %v1137_v44 = vadd.s32 %v2865_v35, %v2877_v8 }
 0x120   :  { %v1149_v42 = vclz %v1882_v19  ;;  %v1229_v6 = vsel %vm1217_vm8, %v1207_v60, %v1210_v39  ;;  %v1296_v59 = vand.u32 8388607, %v1289_v32  ;;  %v1223_v61 = vsel %vm1219_vm9, %v1207_v60, %v1222_v34 }
 0x121   :  { %v1227_v4 = vsel %vm1219_vm9, %v1210_v39, %v1226_v2  ;;  %v1230_v12 = vsel %vm1220_vm10, %v1216_v21, 1326507024  ;;  %v1889_v16 = vadd.s32 4294967169, %v1293_v62  ;;  %v1224_v43 = vsel %vm1218_vm11, %v1221_v53, %v1223_v61 }
 0x122   :  { %v1883_v57 = vadd.s32 4294967294, %v1149_v42  ;;  %v1228_v51 = vsel %vm1218_vm11, %v1225_v47, %v1227_v4  ;;  %v1231_v35 = vsel %vm1219_vm9, %v1213_v22, %v1230_v12  ;;  %v1167_v8 = vsub.s32 4, %v2905_v46 }
 0x123   :  { %v1232_v41 = vsel %vm1218_vm11, %v1229_v6, %v1231_v35  ;;  %v2952_v17 = vmul.u32.u64.low %v2900_v38, %v1228_v51  ;;  %v2953_v33 = vmul.u32.u64.high %v2900_v38, %v1228_v51, %v2952_v17  ;;  %v1299_v13 = vadd.s32 1, %v1889_v16 }
 0x124   :  { %vm1884_vm12 = vcmp.lt.s32.totalorder %v1883_v57, 0  ;;  %v2957_v48 = vmul.u32.u64.low %v2900_v38, %v1232_v41  ;;  %v2958_v36 = vmul.u32.u64.high %v2900_v38, %v1232_v41, %v2957_v48  ;;  %vm1069_vm13 = vweird.f32 %v2142_v24 }
 0x125   :  { %v1071_v14 = vand.u32 3, %v2897_v11  ;;  %vm1083_vm15 = vcmp.lt.s32.totalorder %v2144_v25, 0  ;;  %v1152_v56 = vsel %vm1884_vm12, 0, %v1883_v57  ;;  %v1240_v40 = vmul.u32 %v2900_v38, %v1224_v43 }
 0x126   :  { %v1153_v54 = vsub.s32 32, %v1152_v56  ;;  %v1154_v55 = vshll.u32 %v2921_v9, %v1152_v56  ;;  %v1157_v37 = vsub.s32 4294967266, %v1152_v56  ;;  %vm1300_vm0 = vcmp.gt.s32.totalorder %v1299_v13, 0 }
 0x127   :  { %vm2967_vm14 = vcmp.le.f32.partialorder %v1081_v52, 0.7853982  ;;  %v1243_v20 = vadd.s32 1, %v2953_v33  ;;  %v1297_v50 = vor.u32 8388608, %v1296_v59  ;;  %v1301_v11 = vsel %vm1300_vm0, %v1299_v13, 0 }
 0x128   :  { %v1155_v49 = vshrl.u32 %v1137_v44, %v1153_v54  ;;  %v1158_v60 = vadd.s32 127, %v1157_v37  ;;  %v2975_v38 = vsel %vm1083_vm15, %v1167_v8, %v2905_v46  ;;  %vm1242_vm1 = vc.u32 %v2958_v36, %v2952_v17 }
 0x129   :  { %vm1072_vm2 = vcmp.lt.s32.totalorder %v1071_v14, 2  ;;  %vm1073_vm3 = vcmp.eq.s32.totalorder %v1071_v14, 0  ;;  %v1244_v52 = vsel %vm1242_vm1, %v1243_v20, %v2953_v33  ;;  %v1303_v9 = vand.u32 31, %v1301_v11 }
 0x12a   :  { %v2016_v45 = vpop.eup %2015  ;;  %vm1076_vm4 = vcmp.eq.s32.totalorder %v1071_v14, 2  ;;  %v1156_v23 = vor.u32 %v1155_v49, %v1154_v55  ;;  %v1159_v18 = vshll.u32 %v1158_v60, 23  ;;  %v1245_v0 = vadd.s32 %v1244_v52, %v1240_v40 }
 0x12b   :  { %v2018_v39 = vpop.eup %2017  ;;  %v1077_v22 = vxor.u32 2147483648, %v2016_v45  ;;  %v1170_v46 = vsel %vm2967_vm14, 0, %v2975_v38  ;;  %v1304_v21 = vsub.s32 32, %v1303_v9  ;;  %v2983_v62 = vshll.u32 %v1297_v50, 8 }
 0x12c   :  { %v1074_v19 = vxor.u32 2147483648, %v2018_v39  ;;  %v1160_v53 = vor.u32 4788187, %v1159_v18  ;;  %v1163_v34 = vcvt.s32.f32 %v1156_v23  ;;  %v1246_v47 = vadd.s32 536870912, %v1245_v0 }
 0x12d   :  { %v1078_v2 = vsel %vm1076_vm4, %v1077_v22, %v2018_v39  ;;  %v1302_v44 = vshrl.u32 %v1301_v11, 5  ;;  %v1306_v42 = vshll.u32 %v2092_v63, %v1303_v9  ;;  %v1309_v6 = vshll.u32 %v2093_v1, %v1303_v9 }
 0x12e   :  { %v1075_v59 = vsel %vm1073_vm3, %v2016_v45, %v1074_v19  ;;  %v1161_v61 = vand.u32 2147483647, %v1160_v53  ;;  %v1247_v4 = vshrl.u32 %v1246_v47, 30  ;;  %v1307_v12 = vshrl.u32 %v2093_v1, %v1304_v21 }
 0x12f   :  { %v1079_v16 = vsel %vm1072_vm2, %v1075_v59, %v1078_v2  ;;  %v1310_v57 = vshrl.u32 %v2094_v3, %v1304_v21  ;;  %v1312_v43 = vshll.u32 %v2094_v3, %v1303_v9  ;;  %v1313_v51 = vshrl.u32 %v2095_v5, %v1304_v21 }
 0x130   :  { %v1080_v35 = vsel %vm1069_vm13, nan, %v1079_v16  ;;  %v1164_v8 = vmul.f32 %v1163_v34, %v1161_v61  ;;  %vm1187_vm5 = vcmp.lt.s32.totalorder %v2146_v26, 0  ;;  %v1248_v41 = vshll.u32 %v1247_v4, 30 }
 0x131   :  { %v1396_v33 = vand.u32 2139095040, %v2150_v28  ;;  %v1305_v48 = vshrl.u32 %v2092_v63, %v1304_v21  ;;  %v1315_v13 = vshll.u32 %v2095_v5, %v1303_v9  ;;  %v1316_v14 = vshrl.u32 %v2096_v7, %v1304_v21  ;;  %1817 = vst [vmem:[#allocation5 + $0x40] sm:$0xff] %v1080_v35 }
 0x132   :  { %v1318_v56 = vshll.u32 %v2096_v7, %v1303_v9  ;;  %v1165_v40 = vxor.u32 2147483648, %v1164_v8  ;;  %v1249_v54 = vsub.s32 %v1245_v0, %v1248_v41  ;;  %v1308_v55 = vor.u32 %v1307_v12, %v1306_v42 }
 0x133   :  { %v1319_v24 = vshrl.u32 %v2097_v15, %v1304_v21  ;;  %v1271_v37 = vsub.s32 4, %v1247_v4  ;;  %v1311_v20 = vor.u32 %v1310_v57, %v1309_v6  ;;  %v1314_v50 = vor.u32 %v1313_v51, %v1312_v43 }
 0x134   :  { %v1317_v11 = vor.u32 %v1316_v14, %v1315_v13  ;;  %v1166_v49 = vsel %vm1083_vm15, %v1165_v40, %v1164_v8  ;;  %v1251_v60 = vsub.s32 0, %v1249_v54  ;;  %vm1321_vm6 = vcmp.lt.s32.totalorder %v1302_v44, 1 }
 0x135   :  { %vm1322_vm7 = vcmp.lt.s32.totalorder %v1302_v44, 2  ;;  %v1169_v38 = vsel %vm2967_vm14, %v2144_v25, %v1166_v49  ;;  %v1320_v52 = vor.u32 %v1319_v24, %v1318_v56  ;;  %vm1323_vm8 = vcmp.lt.s32.totalorder %v1302_v44, 3 }
 0x136   :  { %vm1324_vm10 = vcmp.lt.s32.totalorder %v1302_v44, 4  ;;  %2019 = vcosq.f32 %v1169_v38  ;;  %v1886_v9 = vmin.u32 %v1251_v60, %v1249_v54  ;;  %v1325_v45 = vsel %vm1321_vm6, %v1305_v48, %v1308_v55 }
 0x137   :  { %v1326_v23 = vsel %vm1324_vm10, %v1314_v50, 2102212464  ;;  %2021 = vsinq.f32 %v1169_v38  ;;  %v1329_v0 = vsel %vm1321_vm6, %v1308_v55, %v1311_v20  ;;  %v1330_v39 = vsel %vm1324_vm10, %v1317_v11, 920167782 }
 0x138   :  { %v1327_v18 = vsel %vm1323_vm8, %v1311_v20, %v1326_v23  ;;  %v1174_v22 = vadd.s32 3, %v1170_v46  ;;  %vm3014_vm11 = vcmp.le.f32.partialorder %v1185_v10, 0.7853982  ;;  %v1253_v21 = vclz %v1886_v9 }
 0x139   :  { %v1393_v19 = vand.u32 2147483647, %v2150_v28  ;;  %v1272_v53 = vsel %vm1187_vm5, %v1271_v37, %v1247_v4  ;;  %v1331_v34 = vsel %vm1323_vm8, %v1314_v50, %v1330_v39  ;;  %v1333_v47 = vsel %vm1321_vm6, %v1311_v20, %v1314_v50 }
 0x13a   :  { %v1334_v2 = vsel %vm1324_vm10, %v1320_v52, 1326507024  ;;  %v1887_v42 = vadd.s32 4294967294, %v1253_v21  ;;  %v1328_v46 = vsel %vm1322_vm7, %v1325_v45, %v1327_v18  ;;  %v1332_v10 = vsel %vm1322_vm7, %v1329_v0, %v1331_v34 }
 0x13b   :  { %v1335_v6 = vsel %vm1323_vm8, %v1317_v11, %v1334_v2  ;;  %v3029_v61 = vmul.u32.u64.low %v2983_v62, %v1332_v10  ;;  %v3030_v12 = vmul.u32.u64.high %v2983_v62, %v1332_v10, %v3029_v61  ;;  %v1397_v4 = vshrl.u32 %v1396_v33, 23 }
 0x13c   :  { %v1336_v59 = vsel %vm1322_vm7, %v1333_v47, %v1335_v6  ;;  %v1241_v16 = vadd.s32 %v2952_v17, %v2958_v36  ;;  %vm1888_vm9 = vcmp.lt.s32.totalorder %v1887_v42, 0  ;;  %v1274_v35 = vsel %vm3014_vm11, 0, %v1272_v53 }
 0x13d   :  { %v3035_v57 = vmul.u32.u64.low %v2983_v62, %v1336_v59  ;;  %v3036_v43 = vmul.u32.u64.high %v2983_v62, %v1336_v59, %v3035_v57  ;;  %v1256_v51 = vsel %vm1888_vm9, 0, %v1887_v42  ;;  %v1893_v8 = vadd.s32 4294967169, %v1397_v4 }
 0x13e   :  { %v1400_v44 = vand.u32 8388607, %v1393_v19  ;;  %v1257_v41 = vsub.s32 32, %v1256_v51  ;;  %v1258_v48 = vshll.u32 %v1249_v54, %v1256_v51  ;;  %v1261_v13 = vsub.s32 4294967266, %v1256_v51 }
 0x13f   :  { %v1344_v33 = vmul.u32 %v2983_v62, %v1328_v46  ;;  %v1175_v14 = vand.u32 3, %v1174_v22  ;;  %v1347_v17 = vadd.s32 1, %v3030_v12  ;;  %v1403_v36 = vadd.s32 1, %v1893_v8 }
 0x140   :  { %v1259_v56 = vshrl.u32 %v1241_v16, %v1257_v41  ;;  %v1262_v40 = vadd.s32 127, %v1261_v13  ;;  %vm1346_vm12 = vc.u32 %v3036_v43, %v3029_v61  ;;  %v1278_v55 = vadd.s32 3, %v1274_v35 }
 0x141   :  { %v1348_v24 = vsel %vm1346_vm12, %v1347_v17, %v3030_v12  ;;  %v1401_v37 = vor.u32 8388608, %v1400_v44  ;;  %vm1404_vm13 = vcmp.gt.s32.totalorder %v1403_v36, 0  ;;  %vm1173_vm15 = vweird.f32 %v2144_v25 }
 0x142   :  { %v1260_v20 = vor.u32 %v1259_v56, %v1258_v48  ;;  %v1263_v50 = vshll.u32 %v1262_v40, 23  ;;  %v1349_v11 = vadd.s32 %v1348_v24, %v1344_v33  ;;  %v1405_v54 = vsel %vm1404_vm13, %v1403_v36, 0 }
 0x143   :  { %v2020_v49 = vpop.eup %2019  ;;  %vm1177_vm0 = vcmp.eq.s32.totalorder %v1175_v14, 0  ;;  %vm1180_vm14 = vcmp.eq.s32.totalorder %v1175_v14, 2  ;;  %v1407_v62 = vand.u32 31, %v1405_v54  ;;  %vm1176_vm1 = vcmp.lt.s32.totalorder %v1175_v14, 2 }
 0x144   :  { %v2022_v60 = vpop.eup %2021  ;;  %v1181_v38 = vxor.u32 2147483648, %v2020_v49  ;;  %v1264_v52 = vor.u32 4788187, %v1263_v50  ;;  %v1267_v9 = vcvt.s32.f32 %v1260_v20  ;;  %v1350_v45 = vadd.s32 536870912, %v1349_v11 }
 0x145   :  { %v1178_v23 = vxor.u32 2147483648, %v2022_v60  ;;  %v3047_v18 = vand.u32 3, %v1278_v55  ;;  %v1408_v0 = vsub.s32 32, %v1407_v62  ;;  %v3051_v53 = vshll.u32 %v1401_v37, 8 }
 0x146   :  { %v1182_v39 = vsel %vm1180_vm14, %v1181_v38, %v2022_v60  ;;  %v1265_v22 = vand.u32 2147483647, %v1264_v52  ;;  %v3049_v21 = vshrl.u32 %v1350_v45, 30  ;;  %v3055_v47 = vadd.s32 %v3029_v61, %v3036_v43 }
 0x147   :  { %v1179_v34 = vsel %vm1177_vm0, %v2020_v49, %v1178_v23  ;;  %v1410_v2 = vshll.u32 %v2092_v63, %v1407_v62  ;;  %v1413_v42 = vshll.u32 %v2093_v1, %v1407_v62  ;;  %v1411_v59 = vshrl.u32 %v2093_v1, %v1408_v0 }
 0x148   :  { %v1183_v46 = vsel %vm1176_vm1, %v1179_v34, %v1182_v39  ;;  %v1268_v10 = vmul.f32 %v1267_v9, %v1265_v22  ;;  %v1352_v6 = vshll.u32 %v3049_v21, 30  ;;  %v1414_v4 = vshrl.u32 %v2094_v3, %v1408_v0 }
 0x149   :  { %v1184_v12 = vsel %vm1173_vm15, nan, %v1183_v46  ;;  %v1416_v16 = vshll.u32 %v2094_v3, %v1407_v62  ;;  %v1417_v61 = vshrl.u32 %v2095_v5, %v1408_v0  ;;  %v1406_v51 = vshrl.u32 %v1405_v54, 5 }
 0x14a   :  { %v1269_v57 = vxor.u32 2147483648, %v1268_v10  ;;  %v3066_v43 = vsub.s32 %v1349_v11, %v1352_v6  ;;  %v1419_v35 = vshll.u32 %v2095_v5, %v1407_v62  ;;  %1818 = vst [vmem:[#allocation5 + $0x48] sm:$0xff] %v1184_v12  ;;  %v1409_v8 = vshrl.u32 %v2092_v63, %v1408_v0 }
 0x14b   :  { %v1420_v44 = vshrl.u32 %v2096_v7, %v1408_v0  ;;  %v1422_v25 = vshll.u32 %v2096_v7, %v1407_v62  ;;  %v1500_v41 = vand.u32 2139095040, %v2152_v29  ;;  %v1412_v33 = vor.u32 %v1411_v59, %v1410_v2 }
 0x14c   :  { %v1270_v48 = vsel %vm1187_vm5, %v1269_v57, %v1268_v10  ;;  %v1355_v13 = vsub.s32 0, %v3066_v43  ;;  %v1423_v14 = vshrl.u32 %v2097_v15, %v1408_v0  ;;  %v1415_v36 = vor.u32 %v1414_v4, %v1413_v42 }
 0x14d   :  { %v1273_v17 = vsel %vm3014_vm11, %v2146_v26, %v1270_v48  ;;  %v1418_v56 = vor.u32 %v1417_v61, %v1416_v16  ;;  %v1421_v40 = vor.u32 %v1420_v44, %v1419_v35  ;;  %vm1291_vm2 = vcmp.lt.s32.totalorder %v2148_v27, 0 }
 0x14e   :  { %2023 = vcosq.f32 %v1273_v17  ;;  %v1890_v55 = vmin.u32 %v1355_v13, %v3066_v43  ;;  %v1424_v24 = vor.u32 %v1423_v14, %v1422_v25  ;;  %vm1425_vm3 = vcmp.lt.s32.totalorder %v1406_v51, 1 }
 0x14f   :  { %2025 = vsinq.f32 %v1273_v17  ;;  %vm1427_vm4 = vcmp.lt.s32.totalorder %v1406_v51, 3  ;;  %vm1428_vm5 = vcmp.lt.s32.totalorder %v1406_v51, 4  ;;  %v1501_v37 = vshrl.u32 %v1500_v41, 23 }
 0x150   :  { %v1357_v20 = vclz %v1890_v55  ;;  %v1375_v50 = vsub.s32 4, %v3049_v21  ;;  %vm1426_vm6 = vcmp.lt.s32.totalorder %v1406_v51, 2  ;;  %v1429_v58 = vsel %vm1425_vm3, %v1409_v8, %v1412_v33 }
 0x151   :  { %v1430_v11 = vsel %vm1428_vm5, %v1418_v56, 2102212464  ;;  %v1433_v54 = vsel %vm1425_vm3, %v1412_v33, %v1415_v36  ;;  %v1434_v49 = vsel %vm1428_vm5, %v1421_v40, 920167782  ;;  %v1437_v62 = vsel %vm1425_vm3, %v1415_v36, %v1418_v56 }
 0x152   :  { %v1891_v60 = vadd.s32 4294967294, %v1357_v20  ;;  %v1431_v38 = vsel %vm1427_vm4, %v1415_v36, %v1430_v11  ;;  %v1435_v52 = vsel %vm1427_vm4, %v1418_v56, %v1434_v49  ;;  %v1438_v9 = vsel %vm1428_vm5, %v1424_v24, 1326507024 }
 0x153   :  { %v1432_v45 = vsel %vm1426_vm6, %v1429_v58, %v1431_v38  ;;  %v1436_v23 = vsel %vm1426_vm6, %v1433_v54, %v1435_v52  ;;  %v1439_v0 = vsel %vm1427_vm4, %v1421_v40, %v1438_v9  ;;  %v1897_v39 = vadd.s32 4294967169, %v1501_v37 }
 0x154   :  { %vm1892_vm7 = vcmp.lt.s32.totalorder %v1891_v60, 0  ;;  %v1440_v22 = vsel %vm1426_vm6, %v1437_v62, %v1439_v0  ;;  %v3087_v34 = vmul.u32.u64.low %v3051_v53, %v1436_v23  ;;  %v3088_v2 = vmul.u32.u64.high %v3051_v53, %v1436_v23, %v3087_v34 }
 0x155   :  { %v1360_v42 = vsel %vm1892_vm7, 0, %v1891_v60  ;;  %v3092_v46 = vmul.u32.u64.low %v3051_v53, %v1440_v22  ;;  %v3093_v10 = vmul.u32.u64.high %v3051_v53, %v1440_v22, %v3092_v46  ;;  %v1497_v6 = vand.u32 2147483647, %v2152_v29 }
 0x156   :  { %v1361_v59 = vsub.s32 32, %v1360_v42  ;;  %v1362_v12 = vshll.u32 %v3066_v43, %v1360_v42  ;;  %v1365_v4 = vsub.s32 4294967266, %v1360_v42  ;;  %v1507_v16 = vadd.s32 1, %v1897_v39 }
 0x157   :  { %vm1277_vm8 = vweird.f32 %v2146_v26  ;;  %v1376_v61 = vsel %vm1291_vm2, %v1375_v50, %v3049_v21  ;;  %v1448_v57 = vmul.u32 %v3051_v53, %v1432_v45  ;;  %v1451_v8 = vadd.s32 1, %v3088_v2 }
 0x158   :  { %v1363_v51 = vshrl.u32 %v3055_v47, %v1361_v59  ;;  %v1366_v35 = vadd.s32 127, %v1365_v4  ;;  %vm1508_vm10 = vcmp.gt.s32.totalorder %v1507_v16, 0  ;;  %vm3106_vm11 = vcmp.le.f32.partialorder %v1289_v32, 0.7853982 }
 0x159   :  { %vm1450_vm9 = vc.u32 %v3093_v10, %v3087_v34  ;;  %v1504_v21 = vand.u32 8388607, %v1497_v6  ;;  %v1509_v44 = vsel %vm1508_vm10, %v1507_v16, 0  ;;  %vm1280_vm12 = vcmp.lt.s32.totalorder %v3047_v18, 2 }
 0x15a   :  { %v1364_v53 = vor.u32 %v1363_v51, %v1362_v12  ;;  %v1367_v47 = vshll.u32 %v1366_v35, 23  ;;  %v1452_v25 = vsel %vm1450_vm9, %v1451_v8, %v3088_v2  ;;  %vm1284_vm13 = vcmp.eq.s32.totalorder %v3047_v18, 2 }
 0x15b   :  { %v2024_v41 = vpop.eup %2023  ;;  %v1378_v32 = vsel %vm3106_vm11, 0, %v1376_v61  ;;  %v1453_v48 = vadd.s32 %v1452_v25, %v1448_v57  ;;  %v1511_v13 = vand.u32 31, %v1509_v44  ;;  %vm1281_vm15 = vcmp.eq.s32.totalorder %v3047_v18, 0 }
 0x15c   :  { %v2026_v33 = vpop.eup %2025  ;;  %v1285_v14 = vxor.u32 2147483648, %v2024_v41  ;;  %v1368_v17 = vor.u32 4788187, %v1367_v47  ;;  %v1371_v36 = vcvt.s32.f32 %v1364_v53  ;;  %v1505_v55 = vor.u32 8388608, %v1504_v21 }
 0x15d   :  { %v1282_v56 = vxor.u32 2147483648, %v2026_v33  ;;  %v1454_v40 = vadd.s32 536870912, %v1453_v48  ;;  %v1512_v24 = vsub.s32 32, %v1511_v13  ;;  %v1382_v50 = vadd.s32 3, %v1378_v32 }
 0x15e   :  { %v1286_v37 = vsel %vm1284_vm13, %v1285_v14, %v2026_v33  ;;  %v1369_v20 = vand.u32 2147483647, %v1368_v17  ;;  %v1510_v58 = vshrl.u32 %v1509_v44, 5  ;;  %v1514_v49 = vshll.u32 %v2092_v63, %v1511_v13 }
 0x15f   :  { %v1283_v11 = vsel %vm1281_vm15, %v2024_v41, %v1282_v56  ;;  %v3120_v54 = vshrl.u32 %v1454_v40, 30  ;;  %v1517_v62 = vshll.u32 %v2093_v1, %v1511_v13  ;;  %v1515_v52 = vshrl.u32 %v2093_v1, %v1512_v24 }
 0x160   :  { %v1287_v60 = vsel %vm1280_vm12, %v1283_v11, %v1286_v37  ;;  %v1372_v38 = vmul.f32 %v1371_v36, %v1369_v20  ;;  %v1518_v9 = vshrl.u32 %v2094_v3, %v1512_v24  ;;  %v1520_v0 = vshll.u32 %v2094_v3, %v1511_v13 }
 0x161   :  { %v1288_v45 = vsel %vm1277_vm8, nan, %v1287_v60  ;;  %v1456_v23 = vshll.u32 %v3120_v54, 30  ;;  %v1521_v39 = vshrl.u32 %v2095_v5, %v1512_v24  ;;  %v1523_v2 = vshll.u32 %v2095_v5, %v1511_v13 }
 0x162   :  { %v1373_v22 = vxor.u32 2147483648, %v1372_v38  ;;  %vm1529_vm0 = vcmp.lt.s32.totalorder %v1510_v58, 1  ;;  %v3134_v18 = vshll.u32 %v1505_v55, 8  ;;  %1819 = vst [vmem:[#allocation5 + $0x50] sm:$0xff] %v1288_v45  ;;  %v1513_v46 = vshrl.u32 %v2092_v63, %v1512_v24 }
 0x163   :  { %v3136_v42 = vsub.s32 %v1453_v48, %v1456_v23  ;;  %v1524_v26 = vshrl.u32 %v2096_v7, %v1512_v24  ;;  %v1526_v59 = vshll.u32 %v2096_v7, %v1511_v13  ;;  %v1516_v4 = vor.u32 %v1515_v52, %v1514_v49 }
 0x164   :  { %v1374_v12 = vsel %vm1291_vm2, %v1373_v22, %v1372_v38  ;;  %v1519_v16 = vor.u32 %v1518_v9, %v1517_v62  ;;  %v1527_v61 = vshrl.u32 %v2097_v15, %v1512_v24  ;;  %v1522_v35 = vor.u32 %v1521_v39, %v1520_v0 }
 0x165   :  { %v1377_v57 = vsel %vm3106_vm11, %v2148_v27, %v1374_v12  ;;  %v1459_v51 = vsub.s32 0, %v3136_v42  ;;  %v1525_v8 = vor.u32 %v1524_v26, %v1523_v2  ;;  %vm1532_vm14 = vcmp.lt.s32.totalorder %v1510_v58, 4 }
 0x166   :  { %2027 = vcosq.f32 %v1377_v57  ;;  %v1528_v21 = vor.u32 %v1527_v61, %v1526_v59  ;;  %v1604_v44 = vand.u32 2139095040, %v2154_v30  ;;  %vm1530_vm1 = vcmp.lt.s32.totalorder %v1510_v58, 2 }
 0x167   :  { %2029 = vsinq.f32 %v1377_v57  ;;  %v1894_v53 = vmin.u32 %v1459_v51, %v3136_v42  ;;  %vm1531_vm2 = vcmp.lt.s32.totalorder %v1510_v58, 3  ;;  %v1533_v47 = vsel %vm1529_vm0, %v1513_v46, %v1516_v4 }
 0x168   :  { %v1534_v25 = vsel %vm1532_vm14, %v1522_v35, 2102212464  ;;  %v1537_v43 = vsel %vm1529_vm0, %v1516_v4, %v1519_v16  ;;  %v1538_v41 = vsel %vm1532_vm14, %v1525_v8, 920167782  ;;  %v1383_v32 = vand.u32 3, %v1382_v50 }
 0x169   :  { %v1461_v48 = vclz %v1894_v53  ;;  %v1541_v13 = vsel %vm1529_vm0, %v1519_v16, %v1522_v35  ;;  %v1535_v33 = vsel %vm1531_vm2, %v1519_v16, %v1534_v25  ;;  %v1539_v14 = vsel %vm1531_vm2, %v1522_v35, %v1538_v41 }
 0x16a   :  { %v1542_v17 = vsel %vm1532_vm14, %v1528_v21, 1326507024  ;;  %v1605_v36 = vshrl.u32 %v1604_v44, 23  ;;  %v1536_v40 = vsel %vm1530_vm1, %v1533_v47, %v1535_v33  ;;  %v1540_v55 = vsel %vm1530_vm1, %v1537_v43, %v1539_v14 }
 0x16b   :  { %v1895_v56 = vadd.s32 4294967294, %v1461_v48  ;;  %v1543_v24 = vsel %vm1531_vm2, %v1525_v8, %v1542_v17  ;;  %v1449_v37 = vadd.s32 %v3087_v34, %v3093_v10  ;;  %v1479_v52 = vsub.s32 4, %v3120_v54 }
 0x16c   :  { %v1544_v20 = vsel %vm1530_vm1, %v1541_v13, %v1543_v24  ;;  %v3159_v50 = vmul.u32.u64.low %v3134_v18, %v1540_v55  ;;  %v3160_v11 = vmul.u32.u64.high %v3134_v18, %v1540_v55, %v3159_v50  ;;  %v1901_v60 = vadd.s32 4294967169, %v1605_v36 }
 0x16d   :  { %vm1896_vm3 = vcmp.lt.s32.totalorder %v1895_v56, 0  ;;  %v3164_v49 = vmul.u32.u64.low %v3134_v18, %v1544_v20  ;;  %v3165_v62 = vmul.u32.u64.high %v3134_v18, %v1544_v20, %v3164_v49  ;;  %v1552_v9 = vmul.u32 %v3134_v18, %v1536_v40 }
 0x16e   :  { %v1464_v38 = vsel %vm1896_vm3, 0, %v1895_v56  ;;  %v1611_v58 = vadd.s32 1, %v1901_v60  ;;  %vm1381_vm4 = vweird.f32 %v2148_v27  ;;  %vm3173_vm5 = vcmp.le.f32.partialorder %v1393_v19, 0.7853982 }
 0x16f   :  { %v1465_v45 = vsub.s32 32, %v1464_v38  ;;  %v1466_v34 = vshll.u32 %v3136_v42, %v1464_v38  ;;  %v1469_v10 = vsub.s32 4294967266, %v1464_v38  ;;  %vm1395_vm6 = vcmp.lt.s32.totalorder %v2150_v28, 0 }
 0x170   :  { %v1555_v0 = vadd.s32 1, %v3160_v11  ;;  %vm1388_vm7 = vcmp.eq.s32.totalorder %v1383_v32, 2  ;;  %vm1554_vm8 = vc.u32 %v3165_v62, %v3159_v50  ;;  %v1480_v2 = vsel %vm1395_vm6, %v1479_v52, %v3120_v54 }
 0x171   :  { %v1467_v39 = vshrl.u32 %v1449_v37, %v1465_v45  ;;  %v1470_v22 = vadd.s32 127, %v1469_v10  ;;  %v1601_v19 = vand.u32 2147483647, %v2154_v30  ;;  %vm1612_vm10 = vcmp.gt.s32.totalorder %v1611_v58, 0 }
 0x172   :  { %v1556_v18 = vsel %vm1554_vm8, %v1555_v0, %v3160_v11  ;;  %v1613_v12 = vsel %vm1612_vm10, %v1611_v58, 0  ;;  %vm1384_vm11 = vcmp.lt.s32.totalorder %v1383_v32, 2  ;;  %vm1385_vm9 = vcmp.eq.s32.totalorder %v1383_v32, 0 }
 0x173   :  { %v2028_v42 = vpop.eup %2027  ;;  %v1468_v46 = vor.u32 %v1467_v39, %v1466_v34  ;;  %v1471_v26 = vshll.u32 %v1470_v22, 23  ;;  %v1557_v59 = vadd.s32 %v1556_v18, %v1552_v9  ;;  %v1615_v61 = vand.u32 31, %v1613_v12 }
 0x174   :  { %v2030_v4 = vpop.eup %2029  ;;  %v1389_v16 = vxor.u32 2147483648, %v2028_v42  ;;  %v1482_v21 = vsel %vm3173_vm5, 0, %v1480_v2  ;;  %v1608_v44 = vand.u32 8388607, %v1601_v19  ;;  %v1614_v24 = vshrl.u32 %v1613_v12, 5 }
 0x175   :  { %v1386_v57 = vxor.u32 2147483648, %v2030_v4  ;;  %v1472_v51 = vor.u32 4788187, %v1471_v26  ;;  %v1475_v35 = vcvt.s32.f32 %v1468_v46  ;;  %v1558_v8 = vadd.s32 536870912, %v1557_v59 }
 0x176   :  { %v1390_v54 = vsel %vm1388_vm7, %v1389_v16, %v2030_v4  ;;  %v1616_v53 = vsub.s32 32, %v1615_v61  ;;  %v1618_v41 = vshll.u32 %v2092_v63, %v1615_v61  ;;  %v1621_v33 = vshll.u32 %v2093_v1, %v1615_v61 }
 0x177   :  { %v1387_v47 = vsel %vm1385_vm9, %v2028_v42, %v1386_v57  ;;  %v1473_v25 = vand.u32 2147483647, %v1472_v51  ;;  %v3191_v43 = vshrl.u32 %v1558_v8, 30  ;;  %v1624_v14 = vshll.u32 %v2094_v3, %v1615_v61 }
 0x178   :  { %v1391_v48 = vsel %vm1384_vm11, %v1387_v47, %v1390_v54  ;;  %v1619_v13 = vshrl.u32 %v2093_v1, %v1616_v53  ;;  %v1622_v40 = vshrl.u32 %v2094_v3, %v1616_v53  ;;  %v1609_v55 = vor.u32 8388608, %v1608_v44 }
 0x179   :  { %v1392_v17 = vsel %vm1381_vm4, nan, %v1391_v48  ;;  %v1476_v36 = vmul.f32 %v1475_v35, %v1473_v25  ;;  %v1560_v56 = vshll.u32 %v3191_v43, 30  ;;  %v1625_v37 = vshrl.u32 %v2095_v5, %v1616_v53 }
 0x17a   :  { %v1627_v32 = vshll.u32 %v2095_v5, %v1615_v61  ;;  %1820 = vst [vmem:[#allocation5 + $0x58] sm:$0xff] %v1392_v17  ;;  %v1628_v49 = vshrl.u32 %v2096_v7, %v1616_v53  ;;  %v1708_v27 = vand.u32 2139095040, %v2156_v31  ;;  %v1617_v60 = vshrl.u32 %v2092_v63, %v1616_v53 }
 0x17b   :  { %v1477_v20 = vxor.u32 2147483648, %v1476_v36  ;;  %v3204_v11 = vsub.s32 %v1557_v59, %v1560_v56  ;;  %v1620_v38 = vor.u32 %v1619_v13, %v1618_v41  ;;  %v1630_v52 = vshll.u32 %v2096_v7, %v1615_v61 }
 0x17c   :  { %v1631_v9 = vshrl.u32 %v2097_v15, %v1616_v53  ;;  %v1623_v10 = vor.u32 %v1622_v40, %v1621_v33  ;;  %v1626_v58 = vor.u32 %v1625_v37, %v1624_v14  ;;  %v1629_v39 = vor.u32 %v1628_v49, %v1627_v32 }
 0x17d   :  { %v1478_v45 = vsel %vm1395_vm6, %v1477_v20, %v1476_v36  ;;  %v1563_v34 = vsub.s32 0, %v3204_v11  ;;  %vm1633_vm12 = vcmp.lt.s32.totalorder %v1614_v24, 1  ;;  %v1486_v2 = vadd.s32 3, %v1482_v21 }
 0x17e   :  { %v1481_v0 = vsel %vm3173_vm5, %v2150_v28, %v1478_v45  ;;  %v1632_v22 = vor.u32 %v1631_v9, %v1630_v52  ;;  %v1649_v42 = vshll.u32 %v1609_v55, 8  ;;  %vm1635_vm13 = vcmp.lt.s32.totalorder %v1614_v24, 3 }
 0x17f   :  { %2031 = vcosq.f32 %v1481_v0  ;;  %v1898_v18 = vmin.u32 %v1563_v34, %v3204_v11  ;;  %vm1636_vm15 = vcmp.lt.s32.totalorder %v1614_v24, 4  ;;  %v1709_v46 = vshrl.u32 %v1708_v27, 23 }
 0x180   :  { %2033 = vsinq.f32 %v1481_v0  ;;  %vm1634_vm0 = vcmp.lt.s32.totalorder %v1614_v24, 2  ;;  %v1637_v59 = vsel %vm1633_vm12, %v1617_v60, %v1620_v38  ;;  %v1641_v12 = vsel %vm1633_vm12, %v1620_v38, %v1623_v10 }
 0x181   :  { %v1565_v26 = vclz %v1898_v18  ;;  %v1638_v4 = vsel %vm1636_vm15, %v1626_v58, 2102212464  ;;  %v1642_v16 = vsel %vm1636_vm15, %v1629_v39, 920167782  ;;  %v1645_v23 = vsel %vm1633_vm12, %v1623_v10, %v1626_v58 }
 0x182   :  { %v1646_v61 = vsel %vm1636_vm15, %v1632_v22, 1326507024  ;;  %v1639_v51 = vsel %vm1635_vm13, %v1623_v10, %v1638_v4  ;;  %v1643_v35 = vsel %vm1635_vm13, %v1626_v58, %v1642_v16  ;;  %v1487_v54 = vand.u32 3, %v1486_v2 }
 0x183   :  { %v1899_v57 = vadd.s32 4294967294, %v1565_v26  ;;  %v1647_v8 = vsel %vm1635_vm13, %v1629_v39, %v1646_v61  ;;  %v1644_v21 = vsel %vm1634_vm0, %v1641_v12, %v1643_v35  ;;  %v1905_v53 = vadd.s32 4294967169, %v1709_v46 }
 0x184   :  { %v1648_v44 = vsel %vm1634_vm0, %v1645_v23, %v1647_v8  ;;  %v1553_v47 = vadd.s32 %v3159_v50, %v3165_v62  ;;  %v1640_v13 = vsel %vm1634_vm0, %v1637_v59, %v1639_v51  ;;  %vm1485_vm1 = vweird.f32 %v2150_v28 }
 0x185   :  { %vm1900_vm14 = vcmp.lt.s32.totalorder %v1899_v57, 0  ;;  %v3222_v25 = vmul.u32.u64.low %v1649_v42, %v1648_v44  ;;  %v3223_v41 = vmul.u32.u64.high %v1649_v42, %v1648_v44, %v3222_v25  ;;  %v1715_v40 = vadd.s32 1, %v1905_v53 }
 0x186   :  { %v1568_v48 = vsel %vm1900_vm14, 0, %v1899_v57  ;;  %v3226_v33 = vmul.u32.u64.low %v1649_v42, %v1644_v21  ;;  %v3227_v14 = vmul.u32.u64.high %v1649_v42, %v1644_v21, %v3226_v33  ;;  %vm1499_vm2 = vcmp.lt.s32.totalorder %v2152_v29, 0 }
 0x187   :  { %v1569_v17 = vsub.s32 32, %v1568_v48  ;;  %v1570_v36 = vshll.u32 %v3204_v11, %v1568_v48  ;;  %v1573_v56 = vsub.s32 4294967266, %v1568_v48  ;;  %v1705_v50 = vand.u32 2147483647, %v2156_v31 }
 0x188   :  { %vm3236_vm3 = vcmp.le.f32.partialorder %v1497_v6, 0.7853982  ;;  %v1656_v37 = vmul.u32 %v1649_v42, %v1640_v13  ;;  %vm1658_vm4 = vc.u32 %v3223_v41, %v3226_v33  ;;  %vm1488_vm5 = vcmp.lt.s32.totalorder %v1487_v54, 2 }
 0x189   :  { %v1571_v55 = vshrl.u32 %v1553_v47, %v1569_v17  ;;  %v1574_v24 = vadd.s32 127, %v1573_v56  ;;  %v1583_v32 = vsub.s32 4, %v3191_v43  ;;  %v1659_v20 = vadd.s32 1, %v3227_v14 }
 0x18a   :  { %vm1716_vm6 = vcmp.gt.s32.totalorder %v1715_v40, 0  ;;  %vm1489_vm7 = vcmp.eq.s32.totalorder %v1487_v54, 0  ;;  %vm1492_vm8 = vcmp.eq.s32.totalorder %v1487_v54, 2  ;;  %v1712_v38 = vand.u32 8388607, %v1705_v50 }
 0x18b   :  { %v1572_v11 = vor.u32 %v1571_v55, %v1570_v36  ;;  %v1575_v49 = vshll.u32 %v1574_v24, 23  ;;  %v1717_v27 = vsel %vm1716_vm6, %v1715_v40, 0  ;;  %v1660_v60 = vsel %vm1658_vm4, %v1659_v20, %v3227_v14 }
 0x18c   :  { %v2032_v6 = vpop.eup %2031  ;;  %v1719_v52 = vand.u32 31, %v1717_v27  ;;  %v1661_v58 = vadd.s32 %v1660_v60, %v1656_v37  ;;  %v1584_v39 = vsel %vm1499_vm2, %v1583_v32, %v3191_v43  ;;  %v1718_v8 = vshrl.u32 %v1717_v27, 5 }
 0x18d   :  { %v2034_v9 = vpop.eup %2033  ;;  %v1493_v45 = vxor.u32 2147483648, %v2032_v6  ;;  %v1576_v34 = vor.u32 4788187, %v1575_v49  ;;  %v1579_v10 = vcvt.s32.f32 %v1572_v11  ;;  %v1586_v35 = vsel %vm3236_vm3, 0, %v1584_v39 }
 0x18e   :  { %v1490_v0 = vxor.u32 2147483648, %v2034_v9  ;;  %v1720_v22 = vsub.s32 32, %v1719_v52  ;;  %v1722_v2 = vshll.u32 %v2092_v63, %v1719_v52  ;;  %v1662_v46 = vadd.s32 536870912, %v1661_v58 }
 0x18f   :  { %v1494_v18 = vsel %vm1492_vm8, %v1493_v45, %v2034_v9  ;;  %v1577_v42 = vand.u32 2147483647, %v1576_v34  ;;  %v1725_v26 = vshll.u32 %v2093_v1, %v1719_v52  ;;  %v1728_v16 = vshll.u32 %v2094_v3, %v1719_v52 }
 0x190   :  { %v1491_v59 = vsel %vm1489_vm7, %v2032_v6, %v1490_v0  ;;  %v1723_v12 = vshrl.u32 %v2093_v1, %v1720_v22  ;;  %v1726_v4 = vshrl.u32 %v2094_v3, %v1720_v22  ;;  %v3257_v43 = vshrl.u32 %v1662_v46, 30 }
 0x191   :  { %v1495_v23 = vsel %vm1488_vm5, %v1491_v59, %v1494_v18  ;;  %v1580_v61 = vmul.f32 %v1579_v10, %v1577_v42  ;;  %v1729_v57 = vshrl.u32 %v2095_v5, %v1720_v22  ;;  %v1731_v1 = vshll.u32 %v2095_v5, %v1719_v52 }
 0x192   :  { %v1496_v51 = vsel %vm1485_vm1, nan, %v1495_v23  ;;  %v1664_v44 = vshll.u32 %v3257_v43, 30  ;;  %v1713_v3 = vor.u32 8388608, %v1712_v38  ;;  %v1721_v54 = vshrl.u32 %v2092_v63, %v1720_v22 }
 0x193   :  { %v1581_v21 = vxor.u32 2147483648, %v1580_v61  ;;  %1821 = vst [vmem:[#allocation5 + $0x60] sm:$0xff] %v1496_v51  ;;  %v1724_v53 = vor.u32 %v1723_v12, %v1722_v2  ;;  %v1732_v47 = vshrl.u32 %v2096_v7, %v1720_v22  ;;  %v1734_v25 = vshll.u32 %v2096_v7, %v1719_v52 }
 0x194   :  { %v1735_v28 = vshrl.u32 %v2097_v15, %v1720_v22  ;;  %v1665_v13 = vsub.s32 %v1661_v58, %v1664_v44  ;;  %v1727_v14 = vor.u32 %v1726_v4, %v1725_v26  ;;  %v1730_v5 = vor.u32 %v1729_v57, %v1728_v16 }
 0x195   :  { %v1582_v48 = vsel %vm1499_vm2, %v1581_v21, %v1580_v61  ;;  %v1733_v36 = vor.u32 %v1732_v47, %v1731_v1  ;;  %vm1737_vm10 = vcmp.lt.s32.totalorder %v1718_v8, 1  ;;  %vm1739_vm11 = vcmp.lt.s32.totalorder %v1718_v8, 3 }
 0x196   :  { %v1585_v17 = vsel %vm3236_vm3, %v2152_v29, %v1582_v48  ;;  %v1736_v63 = vor.u32 %v1735_v28, %v1734_v25  ;;  %v1667_v56 = vsub.s32 0, %v1665_v13  ;;  %v1753_v40 = vshll.u32 %v1713_v3, 8 }
 0x197   :  { %2035 = vcosq.f32 %v1585_v17  ;;  %vm1738_vm9 = vcmp.lt.s32.totalorder %v1718_v8, 2  ;;  %vm1740_vm12 = vcmp.lt.s32.totalorder %v1718_v8, 4  ;;  %v1741_v7 = vsel %vm1737_vm10, %v1721_v54, %v1724_v53 }
 0x198   :  { %2037 = vsinq.f32 %v1585_v17  ;;  %v1902_v15 = vmin.u32 %v1667_v56, %v1665_v13  ;;  %v1742_v55 = vsel %vm1740_vm12, %v1730_v5, 2102212464  ;;  %v1745_v24 = vsel %vm1737_vm10, %v1724_v53, %v1727_v14 }
 0x199   :  { %v1746_v37 = vsel %vm1740_vm12, %v1733_v36, 920167782  ;;  %v1743_v32 = vsel %vm1739_vm11, %v1727_v14, %v1742_v55  ;;  %v1749_v20 = vsel %vm1737_vm10, %v1727_v14, %v1730_v5  ;;  %v1750_v11 = vsel %vm1740_vm12, %v1736_v63, 1326507024 }
 0x19a   :  { %v1747_v62 = vsel %vm1739_vm11, %v1730_v5, %v1746_v37  ;;  %v1669_v49 = vclz %v1902_v15  ;;  %v1590_v27 = vadd.s32 3, %v1586_v35  ;;  %v1744_v6 = vsel %vm1738_vm9, %v1741_v7, %v1743_v32 }
 0x19b   :  { %v1748_v60 = vsel %vm1738_vm9, %v1745_v24, %v1747_v62  ;;  %v1751_v38 = vsel %vm1739_vm11, %v1733_v36, %v1750_v11  ;;  %v1657_v0 = vadd.s32 %v3226_v33, %v3223_v41  ;;  %v1760_v2 = vmul.u32 %v1753_v40, %v1744_v6 }
 0x19c   :  { %v1903_v52 = vadd.s32 4294967294, %v1669_v49  ;;  %v1752_v9 = vsel %vm1738_vm9, %v1749_v20, %v1751_v38  ;;  %v3281_v45 = vmul.u32.u64.low %v1753_v40, %v1748_v60  ;;  %v3282_v34 = vmul.u32.u64.high %v1753_v40, %v1748_v60, %v3281_v45 }
 0x19d   :  { %v3284_v10 = vmul.u32.u64.low %v1753_v40, %v1752_v9  ;;  %v3285_v58 = vmul.u32.u64.high %v1753_v40, %v1752_v9, %v3284_v10  ;;  %v1591_v39 = vand.u32 3, %v1590_v27  ;;  %vm1589_vm2 = vweird.f32 %v2152_v29 }
 0x19e   :  { %vm1904_vm13 = vcmp.lt.s32.totalorder %v1903_v52, 0  ;;  %v1763_v26 = vadd.s32 1, %v3282_v34  ;;  %vm1603_vm3 = vcmp.lt.s32.totalorder %v2154_v30, 0  ;;  %v1687_v48 = vsub.s32 4, %v3257_v43 }
 0x19f   :  { %v1672_v22 = vsel %vm1904_vm13, 0, %v1903_v52  ;;  %vm1762_vm15 = vc.u32 %v3285_v58, %v3281_v45  ;;  %vm1596_vm0 = vcmp.eq.s32.totalorder %v1591_v39, 2  ;;  %vm1593_vm14 = vcmp.eq.s32.totalorder %v1591_v39, 0 }
 0x1a0   :  { %v1673_v18 = vsub.s32 32, %v1672_v22  ;;  %v1674_v42 = vshll.u32 %v1665_v13, %v1672_v22  ;;  %v1677_v46 = vsub.s32 4294967266, %v1672_v22  ;;  %v1764_v4 = vsel %vm1762_vm15, %v1763_v26, %v3282_v34 }
 0x1a1   :  { %v1765_v23 = vadd.s32 %v1764_v4, %v1760_v2  ;;  %vm1592_vm1 = vcmp.lt.s32.totalorder %v1591_v39, 2  ;;  %vm1602_vm4 = vcmp.le.f32.partialorder %v1601_v19, 0.7853982  ;;  %v1688_v17 = vsel %vm1603_vm3, %v1687_v48, %v3257_v43 }
 0x1a2   :  { %v1675_v59 = vshrl.u32 %v1657_v0, %v1673_v18  ;;  %v1678_v12 = vadd.s32 127, %v1677_v46  ;;  %v1690_v40 = vsel %vm1602_vm4, 0, %v1688_v17  ;;  %v1761_v55 = vadd.s32 %v3281_v45, %v3285_v58 }
 0x1a3   :  { %v1766_v35 = vadd.s32 536870912, %v1765_v23  ;;  %v1694_v15 = vadd.s32 3, %v1690_v40  ;;  %vm1693_vm10 = vweird.f32 %v2154_v30  ;;  %vm1707_vm11 = vcmp.lt.s32.totalorder %v2156_v31, 0 }
 0x1a4   :  { %v2036_v16 = vpop.eup %2035  ;;  %v1676_v33 = vor.u32 %v1675_v59, %v1674_v42  ;;  %v1679_v57 = vshll.u32 %v1678_v12, 23  ;;  %vm1706_vm9 = vcmp.le.f32.partialorder %v1705_v50, 0.7853982 }
 0x1a5   :  { %v2038_v61 = vpop.eup %2037  ;;  %v1597_v41 = vxor.u32 2147483648, %v2036_v16  ;;  %v1767_v3 = vshrl.u32 %v1766_v35, 30  ;;  %v1695_v62 = vand.u32 3, %v1694_v15 }
 0x1a6   :  { %v1594_v51 = vxor.u32 2147483648, %v2038_v61  ;;  %v1680_v1 = vor.u32 4788187, %v1679_v57  ;;  %v1683_v21 = vcvt.s32.f32 %v1676_v33 }
 0x1a7   :  { %v1598_v8 = vsel %vm1596_vm0, %v1597_v41, %v2038_v61  ;;  %v1768_v25 = vshll.u32 %v1767_v3, 30  ;;  %vm1700_vm6 = vcmp.eq.s32.totalorder %v1695_v62, 2  ;;  %vm1697_vm7 = vcmp.eq.s32.totalorder %v1695_v62, 0 }
 0x1a8   :  { %v1595_v44 = vsel %vm1593_vm14, %v2036_v16, %v1594_v51  ;;  %v1681_v53 = vand.u32 2147483647, %v1680_v1  ;;  %vm1696_vm8 = vcmp.lt.s32.totalorder %v1695_v62, 2  ;;  %v1791_v39 = vsub.s32 4, %v1767_v3 }
 0x1a9   :  { %v1599_v54 = vsel %vm1592_vm1, %v1595_v44, %v1598_v8  ;;  %v1769_v13 = vsub.s32 %v1765_v23, %v1768_v25  ;;  %vm1797_vm0 = vweird.f32 %v2156_v31 }
 0x1aa   :  { %v1600_v47 = vsel %vm1589_vm2, nan, %v1599_v54  ;;  %v1684_v28 = vmul.f32 %v1683_v21, %v1681_v53  ;;  %v1792_v42 = vsel %vm1707_vm11, %v1791_v39, %v1767_v3 }
 0x1ab   :  { %1822 = vst [vmem:[#allocation5 + $0x68] sm:$0xff] %v1600_v47  ;;  %v1771_v14 = vsub.s32 0, %v1769_v13 }
 0x1ac   :  { %v1685_v29 = vxor.u32 2147483648, %v1684_v28 }
 0x1ad   :  { %v1906_v63 = vmin.u32 %v1771_v14, %v1769_v13 }
 0x1ae   :  { %v1686_v5 = vsel %vm1603_vm3, %v1685_v29, %v1684_v28 }
 0x1af   :  { %v1689_v36 = vsel %vm1602_vm4, %v2154_v30, %v1686_v5  ;;  %v1773_v56 = vclz %v1906_v63  ;;  %v1794_v30 = vsel %vm1706_vm9, 0, %v1792_v42 }
 0x1b0   :  { %2039 = vcosq.f32 %v1689_v36  ;;  %v1798_v26 = vadd.s32 3, %v1794_v30 }
 0x1b1   :  { %2041 = vsinq.f32 %v1689_v36  ;;  %v1907_v7 = vadd.s32 4294967294, %v1773_v56 }
 0x1b2   :  { %v1799_v59 = vand.u32 3, %v1798_v26 }
 0x1b3   :  { %vm1908_vm5 = vcmp.lt.s32.totalorder %v1907_v7, 0 }
 0x1b4   :  { %v1776_v24 = vsel %vm1908_vm5, 0, %v1907_v7  ;;  %vm1804_vm12 = vcmp.eq.s32.totalorder %v1799_v59, 2  ;;  %vm1801_vm13 = vcmp.eq.s32.totalorder %v1799_v59, 0  ;;  %vm1800_vm15 = vcmp.lt.s32.totalorder %v1799_v59, 2 }
 0x1b5   :  { %v1777_v37 = vsub.s32 32, %v1776_v24  ;;  %v1778_v19 = vshll.u32 %v1769_v13, %v1776_v24  ;;  %v1781_v32 = vsub.s32 4294967266, %v1776_v24 }
 0x1b7   :  { %v1779_v20 = vshrl.u32 %v1761_v55, %v1777_v37  ;;  %v1782_v11 = vadd.s32 127, %v1781_v32 }
 0x1b9   :  { %v1780_v43 = vor.u32 %v1779_v20, %v1778_v19  ;;  %v1783_v49 = vshll.u32 %v1782_v11, 23 }
 0x1bb   :  { %v1784_v6 = vor.u32 4788187, %v1783_v49  ;;  %v1787_v60 = vcvt.s32.f32 %v1780_v43 }
 0x1bd   :  { %v2040_v27 = vpop.eup %2039  ;;  %v1785_v45 = vand.u32 2147483647, %v1784_v6 }
 0x1be   :  { %v2042_v38 = vpop.eup %2041  ;;  %v1701_v52 = vxor.u32 2147483648, %v2040_v27 }
 0x1bf   :  { %v1698_v9 = vxor.u32 2147483648, %v2042_v38  ;;  %v1788_v58 = vmul.f32 %v1787_v60, %v1785_v45 }
 0x1c0   :  { %v1702_v34 = vsel %vm1700_vm6, %v1701_v52, %v2042_v38 }
 0x1c1   :  { %v1699_v10 = vsel %vm1697_vm7, %v2040_v27, %v1698_v9  ;;  %v1789_v2 = vxor.u32 2147483648, %v1788_v58 }
 0x1c2   :  { %v1703_v0 = vsel %vm1696_vm8, %v1699_v10, %v1702_v34 }
 0x1c3   :  { %v1704_v22 = vsel %vm1693_vm10, nan, %v1703_v0  ;;  %v1790_v18 = vsel %vm1707_vm11, %v1789_v2, %v1788_v58 }
 0x1c4   :  { %1823 = vst [vmem:[#allocation5 + $0x70] sm:$0xff] %v1704_v22  ;;  %v1793_v46 = vsel %vm1706_vm9, %v2156_v31, %v1790_v18 }
 0x1c5   :  { %2043 = vcosq.f32 %v1793_v46 }
 0x1c6   :  { %2045 = vsinq.f32 %v1793_v46 }
 0x1d2   :  { %v2044_v12 = vpop.eup %2043 }
 0x1d3   :  { %v2046_v4 = vpop.eup %2045  ;;  %v1805_v16 = vxor.u32 2147483648, %v2044_v12 }
 0x1d4   :  { %v1802_v50 = vxor.u32 2147483648, %v2046_v4 }
 0x1d5   :  { %v1806_v23 = vsel %vm1804_vm12, %v1805_v16, %v2046_v4 }
 0x1d6   :  { %v1803_v61 = vsel %vm1801_vm13, %v2044_v12, %v1802_v50 }
 0x1d7   :  { %v1807_v41 = vsel %vm1800_vm15, %v1803_v61, %v1806_v23 }
 0x1d8   :  { %v1808_v33 = vsel %vm1797_vm0, nan, %v1807_v41 }
 0x1d9   :  { %1824 = vst [vmem:[#allocation5 + $0x78] sm:$0xff] %v1808_v33 }
 0x1da   :  { %2078 = shalt.err (!%p2075_p9)
}
 0x1db   :  { %s2099_s22 = smov 128   ;;  %s2100_s23 = smov 8  }
 0x1dc   :  { %1836 = dma.vmem_to_hbm [thread:$0]  %s1831_s20, 2048, %s3312_s3, [#allocation4], %s2099_s22, %s2099_s22, %s2100_s23  }
 0x1dd   :  { %2089 = dma.done.wait [#allocation4], 2048  }
 0x1de   :  { %2090 = vsyncadd [#allocation4], 4294965248 }
 0x1df   :  { %1840 = vsyncpa [#allocation3], 1 }
 0x1e0   :  { %1841 = vsyncpa [#allocation4], 1 }

</bundles_post_ra>
